<compile_context>
chip_gen: v7x
topology: tpu7x:2x2x1
jax: 0.10.0
libtpu: 0.0.40
codegen_flags: <defaults>
</compile_context>

<pallas_src>
import jax
import jax.numpy as jnp
from jax.experimental import pallas as pl
from jax.experimental.pallas import tpu as pltpu


def _downsample_kernel(x_ref, w_ref, b_ref, o_ref):
    # x_ref: (1, Cin, 2*tile_ho, W)   raw NCHW input slab
    # w_ref: (2, 2*Cout, Cin)         w_ref[kh] = [W[:,:,kh,0] ; W[:,:,kh,1]]
    # b_ref: (Cout, 1)
    # o_ref: (1, Cout, tile_ho, Wo)   NCHW output slab
    w_in = x_ref.shape[3]
    cout = o_ref.shape[1]
    tile_ho = o_ref.shape[2]
    wo = o_ref.shape[3]

    # Constant 0/1 lane-compaction matrices (built once per grid step, VPU-cheap):
    #   s_even[w, wo] = (w == 2*wo),  s_odd[w, wo] = (w == 2*wo + 1)
    rows = jax.lax.broadcasted_iota(jnp.int32, (w_in, wo), 0)
    cols = jax.lax.broadcasted_iota(jnp.int32, (w_in, wo), 1)
    s_even = (rows == 2 * cols).astype(jnp.float32)
    s_odd = (rows == 2 * cols + 1).astype(jnp.float32)

    w_kh0 = w_ref[0]          # (2*Cout, Cin) taps of input row 2*ho   (kh = 0)
    w_kh1 = w_ref[1]          # (2*Cout, Cin) taps of input row 2*ho+1 (kh = 1)
    bias = b_ref[...]         # (Cout, 1), broadcasts over lanes

    for ho in range(tile_ho):                      # static unroll over the tile
        r0 = x_ref[0, :, 2 * ho, :]                # (Cin, W)
        r1 = x_ref[0, :, 2 * ho + 1, :]            # (Cin, W)
        # Channel contraction at full width W; rows [0:Cout] carry the kw=0
        # weights, rows [Cout:2*Cout] carry the kw=1 weights.
        y = (jnp.dot(w_kh0, r0, preferred_element_type=jnp.float32)
             + jnp.dot(w_kh1, r1, preferred_element_type=jnp.float32))   # (2*Cout, W)
        # Pick even columns for the kw=0 half, odd columns for the kw=1 half.
        acc = (jnp.dot(y[:cout, :], s_even, preferred_element_type=jnp.float32)
               + jnp.dot(y[cout:, :], s_odd, preferred_element_type=jnp.float32))
        acc = acc + bias
        o_ref[0, :, ho, :] = jnp.maximum(acc, 0.0).astype(o_ref.dtype)


def _pick_tile_ho(ho, cin, cout, w, budget_bytes=8 << 20, max_unroll=64):
    """Largest multiple-of-8 divisor of Ho whose block fits the VMEM budget."""
    wo = w // 2

    def block_bytes(th):
        return 4 * (cin * 2 * th * w + cout * th * wo)

    best = None
    th = 8
    while th <= min(ho, max_unroll):
        if ho % th == 0 and block_bytes(th) <= budget_bytes:
            best = th
        th += 8
    if best is None:
        best = ho          # full-extent block is always a legal block shape
    return best


@jax.jit
def downsample(x, weight, bias):
    """x: [N, C, H, W] f32; weight: [Cout, C, 2, 2]; bias: [Cout].
    Returns relu(conv2d(x, weight, stride=2) + bias) as [N, Cout, H//2, W//2]."""
    n, cin, h, w = x.shape
    cout = weight.shape[0]
    assert weight.shape == (cout, cin, 2, 2), weight.shape
    assert h % 2 == 0 and w % 2 == 0
    ho, wo = h // 2, w // 2

    tile_ho = _pick_tile_ho(ho, cin, cout, w)

    # Pack the four 2x2 taps into two (2*Cout, Cin) matrices, one per kernel
    # row (kh). Row block [0:Cout] holds the kw=0 taps, [Cout:2*Cout] the kw=1
    # taps. These are tiny; the activation tensor itself is never touched.
    w_kh0 = jnp.concatenate([weight[:, :, 0, 0], weight[:, :, 0, 1]], axis=0)
    w_kh1 = jnp.concatenate([weight[:, :, 1, 0], weight[:, :, 1, 1]], axis=0)
    w_packed = jnp.stack([w_kh0, w_kh1], axis=0)            # (2, 2*Cout, Cin)
    b_col = bias.reshape(cout, 1).astype(jnp.float32)

    flops = 2 * (n * ho * wo) * (4 * cin) * cout
    bytes_accessed = (x.size + n * cout * ho * wo + w_packed.size + cout) * 4

    out = pl.pallas_call(
        _downsample_kernel,
        out_shape=jax.ShapeDtypeStruct((n, cout, ho, wo), x.dtype),
        grid_spec=pltpu.PrefetchScalarGridSpec(
            num_scalar_prefetch=0,
            grid=(n, ho // tile_ho),
            in_specs=[
                pl.BlockSpec((1, cin, 2 * tile_ho, w), lambda b, i: (b, 0, i, 0)),
                pl.BlockSpec((2, 2 * cout, cin), lambda b, i: (0, 0, 0)),
                pl.BlockSpec((cout, 1), lambda b, i: (0, 0)),
            ],
            out_specs=pl.BlockSpec((1, cout, tile_ho, wo),
                                   lambda b, i: (b, 0, i, 0)),
        ),
        compiler_params=pltpu.CompilerParams(
            dimension_semantics=("parallel", "parallel"),
            vmem_limit_bytes=48 * 1024 * 1024,
        ),
        cost_estimate=pl.CostEstimate(
            flops=flops, transcendentals=0, bytes_accessed=bytes_accessed),
    )(x, w_packed, b_col)
    return out


def _reference(x, weight, bias):
    # direct conv reference via lax (NCHW / OIHW)
    y = jax.lax.conv_general_dilated(
        x, weight, window_strides=(2, 2), padding="VALID",
        dimension_numbers=("NCHW", "OIHW", "NCHW"))
    y = y + bias.reshape(1, -1, 1, 1)
    return jnp.maximum(y, 0.0)


if __name__ == "__main__":
    key = jax.random.PRNGKey(0)
    kx, kw_, kb = jax.random.split(key, 3)

    N, C, H, W = 2, 4, 16, 16
    x = jax.random.normal(kx, (N, C, H, W), dtype=jnp.float32)
    # deterministic synthetic Conv2d(C, C, kernel_size=2, stride=2) parameters
    fan_in = C * 2 * 2
    bound = 1.0 / (fan_in ** 0.5)
    weight = jax.random.uniform(kw_, (C, C, 2, 2), jnp.float32, -bound, bound)
    bias = jax.random.uniform(kb, (C,), jnp.float32, -bound, bound)

    out = downsample(x, weight, bias)
    out = jax.block_until_ready(out)

    ref = _reference(x, weight, bias)
    assert out.shape == (N, C, H // 2, W // 2), out.shape
    max_err = float(jnp.max(jnp.abs(out - ref)))
    assert max_err < 1e-4, max_err

    print("KERNEL_OK")
</pallas_src>

<mosaic_0001>
module attributes {stable_mosaic.version = 11 : i64} {
  func.func @_downsample_kernel(%arg0: i32, %arg1: i32, %arg2: memref<1x4x16x16xf32, #tpu.memory_space<vmem>>, %arg3: memref<2x8x4xf32, #tpu.memory_space<vmem>>, %arg4: memref<4x1xf32, #tpu.memory_space<vmem>>, %arg5: memref<1x4x8x8xf32, #tpu.memory_space<vmem>>) attributes {dimension_semantics = [#tpu.dimension_semantics<parallel>, #tpu.dimension_semantics<parallel>], iteration_bounds = array<i64: 2, 1>, scalar_prefetch = 0 : i64, scratch_operands = 0 : i64, tpu.core_type = #tpu.core_type<tc>, window_params = [{transform_indices = @transform_0, window_bounds = array<i64: 1, 4, 16, 16>}, {pipeline_mode = #tpu.pipeline_mode<synchronous>, transform_indices = @transform_1, window_bounds = array<i64: 2, 8, 4>}, {pipeline_mode = #tpu.pipeline_mode<synchronous>, transform_indices = @transform_2, window_bounds = array<i64: 4, 1>}, {transform_indices = @transform_3, window_bounds = array<i64: 1, 4, 8, 8>}]} {
    %0 = tpu.iota {dimensions = array<i32: 0>} : vector<16x8xi32>
    %1 = tpu.iota {dimensions = array<i32: 1>} : vector<16x8xi32>
    %c2_i32 = arith.constant 2 : i32
    %2 = vector.broadcast %c2_i32 : i32 to vector<16x8xi32>
    %3 = arith.muli %2, %1 : vector<16x8xi32>
    %4 = arith.cmpi eq, %0, %3 : vector<16x8xi32>
    %5 = arith.extui %4 : vector<16x8xi1> to vector<16x8xi32>
    %6 = arith.sitofp %5 : vector<16x8xi32> to vector<16x8xf32>
    %c2_i32_0 = arith.constant 2 : i32
    %7 = vector.broadcast %c2_i32_0 : i32 to vector<16x8xi32>
    %8 = arith.muli %7, %1 : vector<16x8xi32>
    %c1_i32 = arith.constant 1 : i32
    %9 = vector.broadcast %c1_i32 : i32 to vector<16x8xi32>
    %10 = arith.addi %8, %9 : vector<16x8xi32>
    %11 = arith.cmpi eq, %0, %10 : vector<16x8xi32>
    %12 = arith.extui %11 : vector<16x8xi1> to vector<16x8xi32>
    %13 = arith.sitofp %12 : vector<16x8xi32> to vector<16x8xf32>
    %c0 = arith.constant 0 : index
    %c0_1 = arith.constant 0 : index
    %c0_2 = arith.constant 0 : index
    %14 = vector.load %arg3[%c0, %c0_1, %c0_2] : memref<2x8x4xf32, #tpu.memory_space<vmem>>, vector<1x8x4xf32>
    %15 = vector.shape_cast %14 : vector<1x8x4xf32> to vector<8x4xf32>
    %c1 = arith.constant 1 : index
    %c0_3 = arith.constant 0 : index
    %c0_4 = arith.constant 0 : index
    %16 = vector.load %arg3[%c1, %c0_3, %c0_4] : memref<2x8x4xf32, #tpu.memory_space<vmem>>, vector<1x8x4xf32>
    %17 = vector.shape_cast %16 : vector<1x8x4xf32> to vector<8x4xf32>
    %c0_5 = arith.constant 0 : index
    %c0_6 = arith.constant 0 : index
    %18 = vector.load %arg4[%c0_5, %c0_6] : memref<4x1xf32, #tpu.memory_space<vmem>>, vector<4x1xf32>
    %c0_7 = arith.constant 0 : index
    %c0_8 = arith.constant 0 : index
    %c0_9 = arith.constant 0 : index
    %c0_10 = arith.constant 0 : index
    %19 = vector.load %arg2[%c0_7, %c0_8, %c0_9, %c0_10] : memref<1x4x16x16xf32, #tpu.memory_space<vmem>>, vector<1x4x1x16xf32>
    %20 = vector.shape_cast %19 : vector<1x4x1x16xf32> to vector<4x16xf32>
    %c0_11 = arith.constant 0 : index
    %c0_12 = arith.constant 0 : index
    %c1_13 = arith.constant 1 : index
    %c0_14 = arith.constant 0 : index
    %21 = vector.load %arg2[%c0_11, %c0_12, %c1_13, %c0_14] : memref<1x4x16x16xf32, #tpu.memory_space<vmem>>, vector<1x4x1x16xf32>
    %22 = vector.shape_cast %21 : vector<1x4x1x16xf32> to vector<4x16xf32>
    %cst = arith.constant dense<0.000000e+00> : vector<8x16xf32>
    %23 = tpu.matmul %15, %20, %cst {dimension_numbers = #tpu.dot_dimension_numbers<[1], [0], [0], [1], [0, 0, 1, 1], [], []>} : vector<8x4xf32>, vector<4x16xf32>, vector<8x16xf32> -> vector<8x16xf32>
    %cst_15 = arith.constant dense<0.000000e+00> : vector<8x16xf32>
    %24 = tpu.matmul %17, %22, %cst_15 {dimension_numbers = #tpu.dot_dimension_numbers<[1], [0], [0], [1], [0, 0, 1, 1], [], []>} : vector<8x4xf32>, vector<4x16xf32>, vector<8x16xf32> -> vector<8x16xf32>
    %25 = arith.addf %23, %24 : vector<8x16xf32>
    %26 = vector.extract_strided_slice %25 {offsets = [0, 0], sizes = [4, 16], strides = [1, 1]} : vector<8x16xf32> to vector<4x16xf32>
    %cst_16 = arith.constant dense<0.000000e+00> : vector<4x8xf32>
    %27 = tpu.matmul %26, %6, %cst_16 {dimension_numbers = #tpu.dot_dimension_numbers<[1], [0], [0], [1], [0, 0, 1, 1], [], []>} : vector<4x16xf32>, vector<16x8xf32>, vector<4x8xf32> -> vector<4x8xf32>
    %28 = vector.extract_strided_slice %25 {offsets = [4, 0], sizes = [4, 16], strides = [1, 1]} : vector<8x16xf32> to vector<4x16xf32>
    %cst_17 = arith.constant dense<0.000000e+00> : vector<4x8xf32>
    %29 = tpu.matmul %28, %13, %cst_17 {dimension_numbers = #tpu.dot_dimension_numbers<[1], [0], [0], [1], [0, 0, 1, 1], [], []>} : vector<4x16xf32>, vector<16x8xf32>, vector<4x8xf32> -> vector<4x8xf32>
    %30 = arith.addf %27, %29 : vector<4x8xf32>
    %31 = vector.broadcast %18 : vector<4x1xf32> to vector<4x8xf32>
    %32 = arith.addf %30, %31 : vector<4x8xf32>
    %cst_18 = arith.constant 0.000000e+00 : f32
    %33 = vector.broadcast %cst_18 : f32 to vector<4x8xf32>
    %34 = arith.maximumf %32, %33 : vector<4x8xf32>
    %c0_19 = arith.constant 0 : index
    %c0_20 = arith.constant 0 : index
    %c0_21 = arith.constant 0 : index
    %c0_22 = arith.constant 0 : index
    %35 = vector.load %arg5[%c0_19, %c0_20, %c0_21, %c0_22] : memref<1x4x8x8xf32, #tpu.memory_space<vmem>>, vector<1x4x1x8xf32>
    %36 = vector.shape_cast %35 : vector<1x4x1x8xf32> to vector<4x8xf32>
    %37 = vector.shape_cast %34 : vector<4x8xf32> to vector<1x4x1x8xf32>
    tpu.vector_store %arg5[%c0_19, %c0_20, %c0_21, %c0_22], %37 {strides = array<i32>} : memref<1x4x8x8xf32, #tpu.memory_space<vmem>>, vector<1x4x1x8xf32>,
    %c0_23 = arith.constant 0 : index
    %c0_24 = arith.constant 0 : index
    %c2 = arith.constant 2 : index
    %c0_25 = arith.constant 0 : index
    %38 = vector.load %arg2[%c0_23, %c0_24, %c2, %c0_25] : memref<1x4x16x16xf32, #tpu.memory_space<vmem>>, vector<1x4x1x16xf32>
    %39 = vector.shape_cast %38 : vector<1x4x1x16xf32> to vector<4x16xf32>
    %c0_26 = arith.constant 0 : index
    %c0_27 = arith.constant 0 : index
    %c3 = arith.constant 3 : index
    %c0_28 = arith.constant 0 : index
    %40 = vector.load %arg2[%c0_26, %c0_27, %c3, %c0_28] : memref<1x4x16x16xf32, #tpu.memory_space<vmem>>, vector<1x4x1x16xf32>
    %41 = vector.shape_cast %40 : vector<1x4x1x16xf32> to vector<4x16xf32>
    %cst_29 = arith.constant dense<0.000000e+00> : vector<8x16xf32>
    %42 = tpu.matmul %15, %39, %cst_29 {dimension_numbers = #tpu.dot_dimension_numbers<[1], [0], [0], [1], [0, 0, 1, 1], [], []>} : vector<8x4xf32>, vector<4x16xf32>, vector<8x16xf32> -> vector<8x16xf32>
    %cst_30 = arith.constant dense<0.000000e+00> : vector<8x16xf32>
    %43 = tpu.matmul %17, %41, %cst_30 {dimension_numbers = #tpu.dot_dimension_numbers<[1], [0], [0], [1], [0, 0, 1, 1], [], []>} : vector<8x4xf32>, vector<4x16xf32>, vector<8x16xf32> -> vector<8x16xf32>
    %44 = arith.addf %42, %43 : vector<8x16xf32>
    %45 = vector.extract_strided_slice %44 {offsets = [0, 0], sizes = [4, 16], strides = [1, 1]} : vector<8x16xf32> to vector<4x16xf32>
    %cst_31 = arith.constant dense<0.000000e+00> : vector<4x8xf32>
    %46 = tpu.matmul %45, %6, %cst_31 {dimension_numbers = #tpu.dot_dimension_numbers<[1], [0], [0], [1], [0, 0, 1, 1], [], []>} : vector<4x16xf32>, vector<16x8xf32>, vector<4x8xf32> -> vector<4x8xf32>
    %47 = vector.extract_strided_slice %44 {offsets = [4, 0], sizes = [4, 16], strides = [1, 1]} : vector<8x16xf32> to vector<4x16xf32>
    %cst_32 = arith.constant dense<0.000000e+00> : vector<4x8xf32>
    %48 = tpu.matmul %47, %13, %cst_32 {dimension_numbers = #tpu.dot_dimension_numbers<[1], [0], [0], [1], [0, 0, 1, 1], [], []>} : vector<4x16xf32>, vector<16x8xf32>, vector<4x8xf32> -> vector<4x8xf32>
    %49 = arith.addf %46, %48 : vector<4x8xf32>
    %50 = vector.broadcast %18 : vector<4x1xf32> to vector<4x8xf32>
    %51 = arith.addf %49, %50 : vector<4x8xf32>
    %cst_33 = arith.constant 0.000000e+00 : f32
    %52 = vector.broadcast %cst_33 : f32 to vector<4x8xf32>
    %53 = arith.maximumf %51, %52 : vector<4x8xf32>
    %c0_34 = arith.constant 0 : index
    %c0_35 = arith.constant 0 : index
    %c1_36 = arith.constant 1 : index
    %c0_37 = arith.constant 0 : index
    %54 = vector.load %arg5[%c0_34, %c0_35, %c1_36, %c0_37] : memref<1x4x8x8xf32, #tpu.memory_space<vmem>>, vector<1x4x1x8xf32>
    %55 = vector.shape_cast %54 : vector<1x4x1x8xf32> to vector<4x8xf32>
    %56 = vector.shape_cast %53 : vector<4x8xf32> to vector<1x4x1x8xf32>
    tpu.vector_store %arg5[%c0_34, %c0_35, %c1_36, %c0_37], %56 {strides = array<i32>} : memref<1x4x8x8xf32, #tpu.memory_space<vmem>>, vector<1x4x1x8xf32>,
    %c0_38 = arith.constant 0 : index
    %c0_39 = arith.constant 0 : index
    %c4 = arith.constant 4 : index
    %c0_40 = arith.constant 0 : index
    %57 = vector.load %arg2[%c0_38, %c0_39, %c4, %c0_40] : memref<1x4x16x16xf32, #tpu.memory_space<vmem>>, vector<1x4x1x16xf32>
    %58 = vector.shape_cast %57 : vector<1x4x1x16xf32> to vector<4x16xf32>
    %c0_41 = arith.constant 0 : index
    %c0_42 = arith.constant 0 : index
    %c5 = arith.constant 5 : index
    %c0_43 = arith.constant 0 : index
    %59 = vector.load %arg2[%c0_41, %c0_42, %c5, %c0_43] : memref<1x4x16x16xf32, #tpu.memory_space<vmem>>, vector<1x4x1x16xf32>
    %60 = vector.shape_cast %59 : vector<1x4x1x16xf32> to vector<4x16xf32>
    %cst_44 = arith.constant dense<0.000000e+00> : vector<8x16xf32>
    %61 = tpu.matmul %15, %58, %cst_44 {dimension_numbers = #tpu.dot_dimension_numbers<[1], [0], [0], [1], [0, 0, 1, 1], [], []>} : vector<8x4xf32>, vector<4x16xf32>, vector<8x16xf32> -> vector<8x16xf32>
    %cst_45 = arith.constant dense<0.000000e+00> : vector<8x16xf32>
    %62 = tpu.matmul %17, %60, %cst_45 {dimension_numbers = #tpu.dot_dimension_numbers<[1], [0], [0], [1], [0, 0, 1, 1], [], []>} : vector<8x4xf32>, vector<4x16xf32>, vector<8x16xf32> -> vector<8x16xf32>
    %63 = arith.addf %61, %62 : vector<8x16xf32>
    %64 = vector.extract_strided_slice %63 {offsets = [0, 0], sizes = [4, 16], strides = [1, 1]} : vector<8x16xf32> to vector<4x16xf32>
    %cst_46 = arith.constant dense<0.000000e+00> : vector<4x8xf32>
    %65 = tpu.matmul %64, %6, %cst_46 {dimension_numbers = #tpu.dot_dimension_numbers<[1], [0], [0], [1], [0, 0, 1, 1], [], []>} : vector<4x16xf32>, vector<16x8xf32>, vector<4x8xf32> -> vector<4x8xf32>
    %66 = vector.extract_strided_slice %63 {offsets = [4, 0], sizes = [4, 16], strides = [1, 1]} : vector<8x16xf32> to vector<4x16xf32>
    %cst_47 = arith.constant dense<0.000000e+00> : vector<4x8xf32>
    %67 = tpu.matmul %66, %13, %cst_47 {dimension_numbers = #tpu.dot_dimension_numbers<[1], [0], [0], [1], [0, 0, 1, 1], [], []>} : vector<4x16xf32>, vector<16x8xf32>, vector<4x8xf32> -> vector<4x8xf32>
    %68 = arith.addf %65, %67 : vector<4x8xf32>
    %69 = vector.broadcast %18 : vector<4x1xf32> to vector<4x8xf32>
    %70 = arith.addf %68, %69 : vector<4x8xf32>
    %cst_48 = arith.constant 0.000000e+00 : f32
    %71 = vector.broadcast %cst_48 : f32 to vector<4x8xf32>
    %72 = arith.maximumf %70, %71 : vector<4x8xf32>
    %c0_49 = arith.constant 0 : index
    %c0_50 = arith.constant 0 : index
    %c2_51 = arith.constant 2 : index
    %c0_52 = arith.constant 0 : index
    %73 = vector.load %arg5[%c0_49, %c0_50, %c2_51, %c0_52] : memref<1x4x8x8xf32, #tpu.memory_space<vmem>>, vector<1x4x1x8xf32>
    %74 = vector.shape_cast %73 : vector<1x4x1x8xf32> to vector<4x8xf32>
    %75 = vector.shape_cast %72 : vector<4x8xf32> to vector<1x4x1x8xf32>
    tpu.vector_store %arg5[%c0_49, %c0_50, %c2_51, %c0_52], %75 {strides = array<i32>} : memref<1x4x8x8xf32, #tpu.memory_space<vmem>>, vector<1x4x1x8xf32>,
    %c0_53 = arith.constant 0 : index
    %c0_54 = arith.constant 0 : index
    %c6 = arith.constant 6 : index
    %c0_55 = arith.constant 0 : index
    %76 = vector.load %arg2[%c0_53, %c0_54, %c6, %c0_55] : memref<1x4x16x16xf32, #tpu.memory_space<vmem>>, vector<1x4x1x16xf32>
    %77 = vector.shape_cast %76 : vector<1x4x1x16xf32> to vector<4x16xf32>
    %c0_56 = arith.constant 0 : index
    %c0_57 = arith.constant 0 : index
    %c7 = arith.constant 7 : index
    %c0_58 = arith.constant 0 : index
    %78 = vector.load %arg2[%c0_56, %c0_57, %c7, %c0_58] : memref<1x4x16x16xf32, #tpu.memory_space<vmem>>, vector<1x4x1x16xf32>
    %79 = vector.shape_cast %78 : vector<1x4x1x16xf32> to vector<4x16xf32>
    %cst_59 = arith.constant dense<0.000000e+00> : vector<8x16xf32>
    %80 = tpu.matmul %15, %77, %cst_59 {dimension_numbers = #tpu.dot_dimension_numbers<[1], [0], [0], [1], [0, 0, 1, 1], [], []>} : vector<8x4xf32>, vector<4x16xf32>, vector<8x16xf32> -> vector<8x16xf32>
    %cst_60 = arith.constant dense<0.000000e+00> : vector<8x16xf32>
    %81 = tpu.matmul %17, %79, %cst_60 {dimension_numbers = #tpu.dot_dimension_numbers<[1], [0], [0], [1], [0, 0, 1, 1], [], []>} : vector<8x4xf32>, vector<4x16xf32>, vector<8x16xf32> -> vector<8x16xf32>
    %82 = arith.addf %80, %81 : vector<8x16xf32>
    %83 = vector.extract_strided_slice %82 {offsets = [0, 0], sizes = [4, 16], strides = [1, 1]} : vector<8x16xf32> to vector<4x16xf32>
    %cst_61 = arith.constant dense<0.000000e+00> : vector<4x8xf32>
    %84 = tpu.matmul %83, %6, %cst_61 {dimension_numbers = #tpu.dot_dimension_numbers<[1], [0], [0], [1], [0, 0, 1, 1], [], []>} : vector<4x16xf32>, vector<16x8xf32>, vector<4x8xf32> -> vector<4x8xf32>
    %85 = vector.extract_strided_slice %82 {offsets = [4, 0], sizes = [4, 16], strides = [1, 1]} : vector<8x16xf32> to vector<4x16xf32>
    %cst_62 = arith.constant dense<0.000000e+00> : vector<4x8xf32>
    %86 = tpu.matmul %85, %13, %cst_62 {dimension_numbers = #tpu.dot_dimension_numbers<[1], [0], [0], [1], [0, 0, 1, 1], [], []>} : vector<4x16xf32>, vector<16x8xf32>, vector<4x8xf32> -> vector<4x8xf32>
    %87 = arith.addf %84, %86 : vector<4x8xf32>
    %88 = vector.broadcast %18 : vector<4x1xf32> to vector<4x8xf32>
    %89 = arith.addf %87, %88 : vector<4x8xf32>
    %cst_63 = arith.constant 0.000000e+00 : f32
    %90 = vector.broadcast %cst_63 : f32 to vector<4x8xf32>
    %91 = arith.maximumf %89, %90 : vector<4x8xf32>
    %c0_64 = arith.constant 0 : index
    %c0_65 = arith.constant 0 : index
    %c3_66 = arith.constant 3 : index
    %c0_67 = arith.constant 0 : index
    %92 = vector.load %arg5[%c0_64, %c0_65, %c3_66, %c0_67] : memref<1x4x8x8xf32, #tpu.memory_space<vmem>>, vector<1x4x1x8xf32>
    %93 = vector.shape_cast %92 : vector<1x4x1x8xf32> to vector<4x8xf32>
    %94 = vector.shape_cast %91 : vector<4x8xf32> to vector<1x4x1x8xf32>
    tpu.vector_store %arg5[%c0_64, %c0_65, %c3_66, %c0_67], %94 {strides = array<i32>} : memref<1x4x8x8xf32, #tpu.memory_space<vmem>>, vector<1x4x1x8xf32>,
    %c0_68 = arith.constant 0 : index
    %c0_69 = arith.constant 0 : index
    %c8 = arith.constant 8 : index
    %c0_70 = arith.constant 0 : index
    %95 = vector.load %arg2[%c0_68, %c0_69, %c8, %c0_70] : memref<1x4x16x16xf32, #tpu.memory_space<vmem>>, vector<1x4x1x16xf32>
    %96 = vector.shape_cast %95 : vector<1x4x1x16xf32> to vector<4x16xf32>
    %c0_71 = arith.constant 0 : index
    %c0_72 = arith.constant 0 : index
    %c9 = arith.constant 9 : index
    %c0_73 = arith.constant 0 : index
    %97 = vector.load %arg2[%c0_71, %c0_72, %c9, %c0_73] : memref<1x4x16x16xf32, #tpu.memory_space<vmem>>, vector<1x4x1x16xf32>
    %98 = vector.shape_cast %97 : vector<1x4x1x16xf32> to vector<4x16xf32>
    %cst_74 = arith.constant dense<0.000000e+00> : vector<8x16xf32>
    %99 = tpu.matmul %15, %96, %cst_74 {dimension_numbers = #tpu.dot_dimension_numbers<[1], [0], [0], [1], [0, 0, 1, 1], [], []>} : vector<8x4xf32>, vector<4x16xf32>, vector<8x16xf32> -> vector<8x16xf32>
    %cst_75 = arith.constant dense<0.000000e+00> : vector<8x16xf32>
    %100 = tpu.matmul %17, %98, %cst_75 {dimension_numbers = #tpu.dot_dimension_numbers<[1], [0], [0], [1], [0, 0, 1, 1], [], []>} : vector<8x4xf32>, vector<4x16xf32>, vector<8x16xf32> -> vector<8x16xf32>
    %101 = arith.addf %99, %100 : vector<8x16xf32>
    %102 = vector.extract_strided_slice %101 {offsets = [0, 0], sizes = [4, 16], strides = [1, 1]} : vector<8x16xf32> to vector<4x16xf32>
    %cst_76 = arith.constant dense<0.000000e+00> : vector<4x8xf32>
    %103 = tpu.matmul %102, %6, %cst_76 {dimension_numbers = #tpu.dot_dimension_numbers<[1], [0], [0], [1], [0, 0, 1, 1], [], []>} : vector<4x16xf32>, vector<16x8xf32>, vector<4x8xf32> -> vector<4x8xf32>
    %104 = vector.extract_strided_slice %101 {offsets = [4, 0], sizes = [4, 16], strides = [1, 1]} : vector<8x16xf32> to vector<4x16xf32>
    %cst_77 = arith.constant dense<0.000000e+00> : vector<4x8xf32>
    %105 = tpu.matmul %104, %13, %cst_77 {dimension_numbers = #tpu.dot_dimension_numbers<[1], [0], [0], [1], [0, 0, 1, 1], [], []>} : vector<4x16xf32>, vector<16x8xf32>, vector<4x8xf32> -> vector<4x8xf32>
    %106 = arith.addf %103, %105 : vector<4x8xf32>
    %107 = vector.broadcast %18 : vector<4x1xf32> to vector<4x8xf32>
    %108 = arith.addf %106, %107 : vector<4x8xf32>
    %cst_78 = arith.constant 0.000000e+00 : f32
    %109 = vector.broadcast %cst_78 : f32 to vector<4x8xf32>
    %110 = arith.maximumf %108, %109 : vector<4x8xf32>
    %c0_79 = arith.constant 0 : index
    %c0_80 = arith.constant 0 : index
    %c4_81 = arith.constant 4 : index
    %c0_82 = arith.constant 0 : index
    %111 = vector.load %arg5[%c0_79, %c0_80, %c4_81, %c0_82] : memref<1x4x8x8xf32, #tpu.memory_space<vmem>>, vector<1x4x1x8xf32>
    %112 = vector.shape_cast %111 : vector<1x4x1x8xf32> to vector<4x8xf32>
    %113 = vector.shape_cast %110 : vector<4x8xf32> to vector<1x4x1x8xf32>
    tpu.vector_store %arg5[%c0_79, %c0_80, %c4_81, %c0_82], %113 {strides = array<i32>} : memref<1x4x8x8xf32, #tpu.memory_space<vmem>>, vector<1x4x1x8xf32>,
    %c0_83 = arith.constant 0 : index
    %c0_84 = arith.constant 0 : index
    %c10 = arith.constant 10 : index
    %c0_85 = arith.constant 0 : index
    %114 = vector.load %arg2[%c0_83, %c0_84, %c10, %c0_85] : memref<1x4x16x16xf32, #tpu.memory_space<vmem>>, vector<1x4x1x16xf32>
    %115 = vector.shape_cast %114 : vector<1x4x1x16xf32> to vector<4x16xf32>
    %c0_86 = arith.constant 0 : index
    %c0_87 = arith.constant 0 : index
    %c11 = arith.constant 11 : index
    %c0_88 = arith.constant 0 : index
    %116 = vector.load %arg2[%c0_86, %c0_87, %c11, %c0_88] : memref<1x4x16x16xf32, #tpu.memory_space<vmem>>, vector<1x4x1x16xf32>
    %117 = vector.shape_cast %116 : vector<1x4x1x16xf32> to vector<4x16xf32>
    %cst_89 = arith.constant dense<0.000000e+00> : vector<8x16xf32>
    %118 = tpu.matmul %15, %115, %cst_89 {dimension_numbers = #tpu.dot_dimension_numbers<[1], [0], [0], [1], [0, 0, 1, 1], [], []>} : vector<8x4xf32>, vector<4x16xf32>, vector<8x16xf32> -> vector<8x16xf32>
    %cst_90 = arith.constant dense<0.000000e+00> : vector<8x16xf32>
    %119 = tpu.matmul %17, %117, %cst_90 {dimension_numbers = #tpu.dot_dimension_numbers<[1], [0], [0], [1], [0, 0, 1, 1], [], []>} : vector<8x4xf32>, vector<4x16xf32>, vector<8x16xf32> -> vector<8x16xf32>
    %120 = arith.addf %118, %119 : vector<8x16xf32>
    %121 = vector.extract_strided_slice %120 {offsets = [0, 0], sizes = [4, 16], strides = [1, 1]} : vector<8x16xf32> to vector<4x16xf32>
    %cst_91 = arith.constant dense<0.000000e+00> : vector<4x8xf32>
    %122 = tpu.matmul %121, %6, %cst_91 {dimension_numbers = #tpu.dot_dimension_numbers<[1], [0], [0], [1], [0, 0, 1, 1], [], []>} : vector<4x16xf32>, vector<16x8xf32>, vector<4x8xf32> -> vector<4x8xf32>
    %123 = vector.extract_strided_slice %120 {offsets = [4, 0], sizes = [4, 16], strides = [1, 1]} : vector<8x16xf32> to vector<4x16xf32>
    %cst_92 = arith.constant dense<0.000000e+00> : vector<4x8xf32>
    %124 = tpu.matmul %123, %13, %cst_92 {dimension_numbers = #tpu.dot_dimension_numbers<[1], [0], [0], [1], [0, 0, 1, 1], [], []>} : vector<4x16xf32>, vector<16x8xf32>, vector<4x8xf32> -> vector<4x8xf32>
    %125 = arith.addf %122, %124 : vector<4x8xf32>
    %126 = vector.broadcast %18 : vector<4x1xf32> to vector<4x8xf32>
    %127 = arith.addf %125, %126 : vector<4x8xf32>
    %cst_93 = arith.constant 0.000000e+00 : f32
    %128 = vector.broadcast %cst_93 : f32 to vector<4x8xf32>
    %129 = arith.maximumf %127, %128 : vector<4x8xf32>
    %c0_94 = arith.constant 0 : index
    %c0_95 = arith.constant 0 : index
    %c5_96 = arith.constant 5 : index
    %c0_97 = arith.constant 0 : index
    %130 = vector.load %arg5[%c0_94, %c0_95, %c5_96, %c0_97] : memref<1x4x8x8xf32, #tpu.memory_space<vmem>>, vector<1x4x1x8xf32>
    %131 = vector.shape_cast %130 : vector<1x4x1x8xf32> to vector<4x8xf32>
    %132 = vector.shape_cast %129 : vector<4x8xf32> to vector<1x4x1x8xf32>
    tpu.vector_store %arg5[%c0_94, %c0_95, %c5_96, %c0_97], %132 {strides = array<i32>} : memref<1x4x8x8xf32, #tpu.memory_space<vmem>>, vector<1x4x1x8xf32>,
    %c0_98 = arith.constant 0 : index
    %c0_99 = arith.constant 0 : index
    %c12 = arith.constant 12 : index
    %c0_100 = arith.constant 0 : index
    %133 = vector.load %arg2[%c0_98, %c0_99, %c12, %c0_100] : memref<1x4x16x16xf32, #tpu.memory_space<vmem>>, vector<1x4x1x16xf32>
    %134 = vector.shape_cast %133 : vector<1x4x1x16xf32> to vector<4x16xf32>
    %c0_101 = arith.constant 0 : index
    %c0_102 = arith.constant 0 : index
    %c13 = arith.constant 13 : index
    %c0_103 = arith.constant 0 : index
    %135 = vector.load %arg2[%c0_101, %c0_102, %c13, %c0_103] : memref<1x4x16x16xf32, #tpu.memory_space<vmem>>, vector<1x4x1x16xf32>
    %136 = vector.shape_cast %135 : vector<1x4x1x16xf32> to vector<4x16xf32>
    %cst_104 = arith.constant dense<0.000000e+00> : vector<8x16xf32>
    %137 = tpu.matmul %15, %134, %cst_104 {dimension_numbers = #tpu.dot_dimension_numbers<[1], [0], [0], [1], [0, 0, 1, 1], [], []>} : vector<8x4xf32>, vector<4x16xf32>, vector<8x16xf32> -> vector<8x16xf32>
    %cst_105 = arith.constant dense<0.000000e+00> : vector<8x16xf32>
    %138 = tpu.matmul %17, %136, %cst_105 {dimension_numbers = #tpu.dot_dimension_numbers<[1], [0], [0], [1], [0, 0, 1, 1], [], []>} : vector<8x4xf32>, vector<4x16xf32>, vector<8x16xf32> -> vector<8x16xf32>
    %139 = arith.addf %137, %138 : vector<8x16xf32>
    %140 = vector.extract_strided_slice %139 {offsets = [0, 0], sizes = [4, 16], strides = [1, 1]} : vector<8x16xf32> to vector<4x16xf32>
    %cst_106 = arith.constant dense<0.000000e+00> : vector<4x8xf32>
    %141 = tpu.matmul %140, %6, %cst_106 {dimension_numbers = #tpu.dot_dimension_numbers<[1], [0], [0], [1], [0, 0, 1, 1], [], []>} : vector<4x16xf32>, vector<16x8xf32>, vector<4x8xf32> -> vector<4x8xf32>
    %142 = vector.extract_strided_slice %139 {offsets = [4, 0], sizes = [4, 16], strides = [1, 1]} : vector<8x16xf32> to vector<4x16xf32>
    %cst_107 = arith.constant dense<0.000000e+00> : vector<4x8xf32>
    %143 = tpu.matmul %142, %13, %cst_107 {dimension_numbers = #tpu.dot_dimension_numbers<[1], [0], [0], [1], [0, 0, 1, 1], [], []>} : vector<4x16xf32>, vector<16x8xf32>, vector<4x8xf32> -> vector<4x8xf32>
    %144 = arith.addf %141, %143 : vector<4x8xf32>
    %145 = vector.broadcast %18 : vector<4x1xf32> to vector<4x8xf32>
    %146 = arith.addf %144, %145 : vector<4x8xf32>
    %cst_108 = arith.constant 0.000000e+00 : f32
    %147 = vector.broadcast %cst_108 : f32 to vector<4x8xf32>
    %148 = arith.maximumf %146, %147 : vector<4x8xf32>
    %c0_109 = arith.constant 0 : index
    %c0_110 = arith.constant 0 : index
    %c6_111 = arith.constant 6 : index
    %c0_112 = arith.constant 0 : index
    %149 = vector.load %arg5[%c0_109, %c0_110, %c6_111, %c0_112] : memref<1x4x8x8xf32, #tpu.memory_space<vmem>>, vector<1x4x1x8xf32>
    %150 = vector.shape_cast %149 : vector<1x4x1x8xf32> to vector<4x8xf32>
    %151 = vector.shape_cast %148 : vector<4x8xf32> to vector<1x4x1x8xf32>
    tpu.vector_store %arg5[%c0_109, %c0_110, %c6_111, %c0_112], %151 {strides = array<i32>} : memref<1x4x8x8xf32, #tpu.memory_space<vmem>>, vector<1x4x1x8xf32>,
    %c0_113 = arith.constant 0 : index
    %c0_114 = arith.constant 0 : index
    %c14 = arith.constant 14 : index
    %c0_115 = arith.constant 0 : index
    %152 = vector.load %arg2[%c0_113, %c0_114, %c14, %c0_115] : memref<1x4x16x16xf32, #tpu.memory_space<vmem>>, vector<1x4x1x16xf32>
    %153 = vector.shape_cast %152 : vector<1x4x1x16xf32> to vector<4x16xf32>
    %c0_116 = arith.constant 0 : index
    %c0_117 = arith.constant 0 : index
    %c15 = arith.constant 15 : index
    %c0_118 = arith.constant 0 : index
    %154 = vector.load %arg2[%c0_116, %c0_117, %c15, %c0_118] : memref<1x4x16x16xf32, #tpu.memory_space<vmem>>, vector<1x4x1x16xf32>
    %155 = vector.shape_cast %154 : vector<1x4x1x16xf32> to vector<4x16xf32>
    %cst_119 = arith.constant dense<0.000000e+00> : vector<8x16xf32>
    %156 = tpu.matmul %15, %153, %cst_119 {dimension_numbers = #tpu.dot_dimension_numbers<[1], [0], [0], [1], [0, 0, 1, 1], [], []>} : vector<8x4xf32>, vector<4x16xf32>, vector<8x16xf32> -> vector<8x16xf32>
    %cst_120 = arith.constant dense<0.000000e+00> : vector<8x16xf32>
    %157 = tpu.matmul %17, %155, %cst_120 {dimension_numbers = #tpu.dot_dimension_numbers<[1], [0], [0], [1], [0, 0, 1, 1], [], []>} : vector<8x4xf32>, vector<4x16xf32>, vector<8x16xf32> -> vector<8x16xf32>
    %158 = arith.addf %156, %157 : vector<8x16xf32>
    %159 = vector.extract_strided_slice %158 {offsets = [0, 0], sizes = [4, 16], strides = [1, 1]} : vector<8x16xf32> to vector<4x16xf32>
    %cst_121 = arith.constant dense<0.000000e+00> : vector<4x8xf32>
    %160 = tpu.matmul %159, %6, %cst_121 {dimension_numbers = #tpu.dot_dimension_numbers<[1], [0], [0], [1], [0, 0, 1, 1], [], []>} : vector<4x16xf32>, vector<16x8xf32>, vector<4x8xf32> -> vector<4x8xf32>
    %161 = vector.extract_strided_slice %158 {offsets = [4, 0], sizes = [4, 16], strides = [1, 1]} : vector<8x16xf32> to vector<4x16xf32>
    %cst_122 = arith.constant dense<0.000000e+00> : vector<4x8xf32>
    %162 = tpu.matmul %161, %13, %cst_122 {dimension_numbers = #tpu.dot_dimension_numbers<[1], [0], [0], [1], [0, 0, 1, 1], [], []>} : vector<4x16xf32>, vector<16x8xf32>, vector<4x8xf32> -> vector<4x8xf32>
    %163 = arith.addf %160, %162 : vector<4x8xf32>
    %164 = vector.broadcast %18 : vector<4x1xf32> to vector<4x8xf32>
    %165 = arith.addf %163, %164 : vector<4x8xf32>
    %cst_123 = arith.constant 0.000000e+00 : f32
    %166 = vector.broadcast %cst_123 : f32 to vector<4x8xf32>
    %167 = arith.maximumf %165, %166 : vector<4x8xf32>
    %c0_124 = arith.constant 0 : index
    %c0_125 = arith.constant 0 : index
    %c7_126 = arith.constant 7 : index
    %c0_127 = arith.constant 0 : index
    %168 = vector.load %arg5[%c0_124, %c0_125, %c7_126, %c0_127] : memref<1x4x8x8xf32, #tpu.memory_space<vmem>>, vector<1x4x1x8xf32>
    %169 = vector.shape_cast %168 : vector<1x4x1x8xf32> to vector<4x8xf32>
    %170 = vector.shape_cast %167 : vector<4x8xf32> to vector<1x4x1x8xf32>
    tpu.vector_store %arg5[%c0_124, %c0_125, %c7_126, %c0_127], %170 {strides = array<i32>} : memref<1x4x8x8xf32, #tpu.memory_space<vmem>>, vector<1x4x1x8xf32>,
    return
  }
  func.func @transform_0(%arg0: i32, %arg1: i32) -> (i32, i32, i32, i32) {
    %c0_i32 = arith.constant 0 : i32
    %c0_i32_0 = arith.constant 0 : i32
    %c0_i32_1 = arith.constant 0 : i32
    return %arg0, %c0_i32, %arg1, %c0_i32_0 : i32, i32, i32, i32
  }
  func.func @transform_1(%arg0: i32, %arg1: i32) -> (i32, i32, i32) {
    %c0_i32 = arith.constant 0 : i32
    %c0_i32_0 = arith.constant 0 : i32
    %c0_i32_1 = arith.constant 0 : i32
    %c0_i32_2 = arith.constant 0 : i32
    return %c0_i32, %c0_i32_0, %c0_i32_1 : i32, i32, i32
  }
  func.func @transform_2(%arg0: i32, %arg1: i32) -> (i32, i32) {
    %c0_i32 = arith.constant 0 : i32
    %c0_i32_0 = arith.constant 0 : i32
    %c0_i32_1 = arith.constant 0 : i32
    return %c0_i32, %c0_i32_0 : i32, i32
  }
  func.func @transform_3(%arg0: i32, %arg1: i32) -> (i32, i32, i32, i32) {
    %c0_i32 = arith.constant 0 : i32
    %c0_i32_0 = arith.constant 0 : i32
    %c0_i32_1 = arith.constant 0 : i32
    return %arg0, %c0_i32, %arg1, %c0_i32_0 : i32, i32, i32, i32
  }
}

</mosaic_0001>

<bundles_post_ra>
// kernel: downsample.1
= control target key start
LH: loop header
LB: loop body
LE: loop exit
PB: predicated region body
PF: predicated region fallthrough
CT: control target
= control target key end

     0   :  { %8 = vsyncpa [#allocation3], 0  ;;  %s4349_s0 = inlined_call_operand.vmem [shape: f32[2,4,16,16], index: 0, kind: input, shape index: {}]   ;;  %s4350_s1 = inlined_call_operand.vmem [shape: f32[2,8,4], index: 1, kind: input, shape index: {}]   ;;  %s4351_s2 = inlined_call_operand.vmem [shape: f32[4,1], index: 2, kind: input, shape index: {}]   ;;  %s4352_s3 = inlined_call_operand.hbm [shape: f32[2,4,8,8], index: 3, kind: output, shape index: {}]  }
   0x1   :  { %10 = vsyncpa [#allocation3 + $0x1], 0  ;;  %s3766_s12 = smov 0   ;;  %s3768_s13 = smov 0  }
   0x2   :  { %s3770_s14 = smov 0   ;;  %s3772_s15 = smov 0  }
   0x3   :  { %s3774_s16 = smov 0   ;;  %s3776_s17 = smov 0  }
   0x4 LB: > { %s3157_s18 = sadd.s32 4294967295, %s3735_s17   ;;  %s3158_s19 = sadd.s32 4294967294, %s3735_s17   ;;  %s3735_s17 = sphi %s3776_s17, %s16_s17   ;;  %s3731_s16 = sphi %s3774_s16, %s4363_s16   ;;  %s3727_s15 = sphi %s3772_s15, %s4362_s15   ;;  %s3723_s14 = sphi %s3770_s14, %s4361_s14   ;;  %s3719_s13 = sphi %s3768_s13, %s4360_s13   ;;  %s3715_s12 = sphi %s3766_s12, %s4359_s12  }
   0x5   : > { %s28_s20 = sadd.s32 1, %s3731_s16  ;;  %s107_s21 = sadd.s32 1, %s3723_s14 }
   0x6   : > { %p30_p0 = scmp.ge.s32.totalorder %s28_s20, 2  ;;  %p117_p1 = scmp.ne.s32.totalorder %s3723_s14, %s3719_s13 }
   0x7   : > { %p118_p2 = scmp.eq.s32.totalorder %s3157_s18, 1  ;;  %p123_p3 = scmp.ne.s32.totalorder %s3719_s13, %s3715_s12 }
   0x8   : > { %s4365_s20 = smov (%p30_p0, %s28_s20), 0  ;;  %p124_p5 = scmp.eq.s32.totalorder %s3158_s19, 1 }
   0x9   : > { %p3806_p4 = por %p118_p2, %p117_p1  ;;  %s102_s23 = ssub.s32 %s3731_s16, %s4365_s20 }
   0xa   : > { %p3161_p6 = scmp.ge.s32.totalorder %s3735_s17, 1  ;;  %p105_p7 = scmp.eq.s32.totalorder %s102_s23, 0 }
   0xb   : > { %p3813_p8 = por %p124_p5, %p123_p3  ;;  %p161_p9 = scmp.lt.s32.totalorder %s3735_s17, 3 }
   0xc   : > { %s3819_s25 = scalar_select %p105_p7, %s3723_s14, %s107_s21  }
   0xd   : > { %p162_p10 = pnand %p3161_p6, %p161_p9 }
   0xe   : > { %p190_p11 = scmp.lt.s32.totalorder (!%p162_p10), %s3727_s15, 1  ;;  %v3737_v0 = vmov (!%p162_p10), 0.0   ;;  %vm3738_vm0 = vmmov (!%p162_p10), 0   ;;  %v3739_v1 = vmov (!%p162_p10), 0.0|0.0   ;;  %vm235_vm1 = vcmask (!%p162_p10), 1041409   ;;  %v3842_v10 = vld [vmem:[%s4350_s1 + $0x8] sm:$0xff] (!%p162_p10) }
   0xf   : > { %165 = sbr.rel (%p162_p10) target bundleno = 584 (0x248), region = 32  ;;  %3337 = vmatprep.subr.mxu0 (!%p162_p10), %v3737_v0  ;;  %3339 = vmatprep.mubr.msk.f32.mxu0 (!%p162_p10), %vm3738_vm0, %v3737_v0  ;;  %vm238_vm2 = vcmask (!%p162_p10), 1042434   ;;  %vm241_vm3 = vcmask (!%p162_p10), 1043459   ;;  %vm247_vm4 = vcmask (!%p162_p10), 1043456   ;;  %vm243_vm5 = vcmask (!%p162_p10), 31744   ;;  %v3875_v39 = vld [vmem:[%s4350_s1] sm:$0xff] (!%p162_p10) }
  0x10   : > { %3529 = vmatprep.subr.bf16.mxu1 (!%p162_p10), %v3739_v1  ;;  %3351 = vmatprep.mubr.msk.f32.mxu1 (!%p162_p10), %vm3738_vm0, %v3737_v0  ;;  %vm407_vm12 = vcmask (!%p162_p10), 130048   ;;  %s186_s10 = sand.u32 (!%p162_p10), 1, %s3719_s13   ;;  %vm588_vm13 = vcmask (!%p162_p10), 57344   ;;  %s3256_s19 = sshll.u32 (!%p162_p10), %s3727_s15, 9 }
  0x11   : > { %s3162_s11 = sshll.u32 (!%p162_p10), %s186_s10, 5  ;;  %s3743_s29 = smov (!%p162_p10), [#allocation2]  }
  0x12   : > { %s4198_s18 = scalar_lea.vmem (!%p162_p10), [#allocation2], %s3162_s11 }
  0x13   : > { %s3079_s21 = sshll.u32 (!%p162_p10), %s4198_s18, 4  ;;  %s4293_s21 = int_to_ptr.vmem [resolvable:$true] %s3079_s21 }
  0x14   : > { %s3657_s28 = scalar_lea.vmem (!%p162_p10), %s4293_s21, 512 }
  0x15   : > { %p3658_p12 = scmp.ne.s32.totalorder (!%p162_p10), %s4293_s21, %s3657_s28 }
  0x16   : > { %s191_s26 = scalar_select %p190_p11, %s3727_s15, 1 }
  0x17   : > { %s4303_s15 = scalar_lea.sflag [#allocation3], %s186_s10  ;;  %p3659_p13 = pnand %p3658_p12, %p3806_p4 }
  0x18   : > { %s3255_s27 = sshll.u32 %s191_s26, 6 }
  0x19   : > { %s3832_s30 = scalar_lea.vmem %s4349_s0, %s3255_s27  ;;  %s4291_s27 = scalar_lea.hbm %s4352_s3, %s3256_s19 }
  0x1a   : > { %v226_v2 = vld [vmem:[%s3832_s30 + $0x1] sm:$0x1]  ;;  %v227_v3 = vld [vmem:[%s3832_s30 + $0x11] sm:$0x1]  ;;  %v222_v8 = vld [vmem:[%s3832_s30] sm:$0x1]  ;;  %p3660_p0 = pneg %p3659_p13 }
  0x1b   : > { %v228_v4 = vld [vmem:[%s3832_s30 + $0x21] sm:$0x1]  ;;  %v229_v5 = vld [vmem:[%s3832_s30 + $0x31] sm:$0x1]  ;;  %v234_v6 = vrot.slane %v227_v3, 7 }
  0x1c   : > { %v237_v7 = vrot.slane %v228_v4, 6  ;;  %v240_v9 = vrot.slane %v229_v5, 5  ;;  %v223_v11 = vld [vmem:[%s3832_s30 + $0x10] sm:$0x1]  ;;  %v224_v12 = vld [vmem:[%s3832_s30 + $0x20] sm:$0x1] }
  0x1d   : > { %v236_v13 = vsel %vm235_vm1, %v234_v6, %v226_v2  ;;  %v225_v14 = vld [vmem:[%s3832_s30 + $0x30] sm:$0x1]  ;;  %v324_v15 = vrot.slane %v223_v11, 7  ;;  %v326_v16 = vrot.slane %v224_v12, 6  ;;  %v597_v17 = vld [vmem:[%s3832_s30 + $0x3] sm:$0x1] }
  0x1e   : > { %v239_v18 = vsel %vm238_vm2, %v237_v7, %v236_v13  ;;  %v328_v19 = vrot.slane %v225_v14, 5  ;;  %v598_v20 = vld [vmem:[%s3832_s30 + $0x13] sm:$0x1]  ;;  %v599_v21 = vld [vmem:[%s3832_s30 + $0x23] sm:$0x1] }
  0x1f   : > { %v242_v22 = vsel %vm241_vm3, %v240_v9, %v239_v18  ;;  %v325_v23 = vsel %vm235_vm1, %v324_v15, %v222_v8  ;;  %v605_v24 = vrot.slane %v598_v20, 7  ;;  %v600_v26 = vld [vmem:[%s3832_s30 + $0x33] sm:$0x1]  ;;  %v607_v27 = vrot.slane %v599_v21, 6  ;;  %v594_v28 = vld [vmem:[%s3832_s30 + $0x12] sm:$0x1] }
  0x20   : > { %3338 = vmatpush3.msk.msra.mxu0 %vm247_vm4, %v242_v22  ;;  %v327_v25 = vsel %vm238_vm2, %v326_v16, %v325_v23  ;;  %v595_v31 = vld [vmem:[%s3832_s30 + $0x22] sm:$0x1]  ;;  %v687_v32 = vrot.slane %v594_v28, 7  ;;  %v609_v34 = vrot.slane %v600_v26, 5  ;;  %v596_v36 = vld [vmem:[%s3832_s30 + $0x32] sm:$0x1] }
  0x21   : > { %3340 = vmatmul.mubr.msk.f32.vlgmr.msra.gmra.mrb[0].mxu0 %vm243_vm5, %v3842_v10  ;;  %3342 = vmatprep.subr.mxu0 %v3737_v0  ;;  %v329_v29 = vsel %vm241_vm3, %v328_v19, %v327_v25  ;;  %v606_v30 = vsel %vm235_vm1, %v605_v24, %v597_v17  ;;  %v593_v33 = vld [vmem:[%s3832_s30 + $0x2] sm:$0x1]  ;;  %v689_v37 = vrot.slane %v595_v31, 6  ;;  %v951_v40 = vld [vmem:[%s3832_s30 + $0x15] sm:$0x1]  ;;  %v691_v42 = vrot.slane %v596_v36, 5 }
  0x22   : > { %3343 = vmatpush3.msk.msra.mxu0 %vm247_vm4, %v329_v29  ;;  %3344 = vmatprep.mubr.msk.f32.mxu0 %vm3738_vm0, %v3737_v0  ;;  %v608_v35 = vsel %vm238_vm2, %v607_v27, %v606_v30  ;;  %v688_v38 = vsel %vm235_vm1, %v687_v32, %v593_v33  ;;  %v952_v44 = vld [vmem:[%s3832_s30 + $0x25] sm:$0x1]  ;;  %v958_v45 = vrot.slane %v951_v40, 7  ;;  %v947_v46 = vld [vmem:[%s3832_s30 + $0x14] sm:$0x1] }
  0x23   : > { %3361 = vmatprep.subr.mxu0 %v3737_v0  ;;  %v610_v41 = vsel %vm241_vm3, %v609_v34, %v608_v35  ;;  %v690_v43 = vsel %vm238_vm2, %v689_v37, %v688_v38  ;;  %v950_v47 = vld [vmem:[%s3832_s30 + $0x5] sm:$0x1]  ;;  %v953_v49 = vld [vmem:[%s3832_s30 + $0x35] sm:$0x1]  ;;  %v960_v50 = vrot.slane %v952_v44, 6  ;;  %v1040_v52 = vrot.slane %v947_v46, 7 }
  0x24   : > { %v692_v48 = vsel %vm241_vm3, %v691_v42, %v690_v43  ;;  %v948_v51 = vld [vmem:[%s3832_s30 + $0x24] sm:$0x1]  ;;  %v959_v53 = vsel %vm235_vm1, %v958_v45, %v950_v47  ;;  %v949_v55 = vld [vmem:[%s3832_s30 + $0x34] sm:$0x1]  ;;  %v962_v56 = vrot.slane %v953_v49, 5 }
  0x25   : > { %v946_v54 = vld [vmem:[%s3832_s30 + $0x4] sm:$0x1]  ;;  %v1042_v57 = vrot.slane %v948_v51, 6  ;;  %v961_v58 = vsel %vm238_vm2, %v960_v50, %v959_v53  ;;  %v1044_v60 = vrot.slane %v949_v55, 5  ;;  %v1304_v61 = vld [vmem:[%s3832_s30 + $0x17] sm:$0x1] }
  0x26   : > { %v1041_v59 = vsel %vm235_vm1, %v1040_v52, %v946_v54  ;;  %v1305_v62 = vld [vmem:[%s3832_s30 + $0x27] sm:$0x1]  ;;  %v2362_v63 = vld [vmem:[%s3832_s30 + $0xd] sm:$0x1]  ;;  %v2363_v2 = vld [vmem:[%s3832_s30 + $0x1d] sm:$0x1]  ;;  %v963_v4 = vsel %vm241_vm3, %v962_v56, %v961_v58 }
  0x27   : > { %v2364_v3 = vld [vmem:[%s3832_s30 + $0x2d] sm:$0x1]  ;;  %v1043_v5 = vsel %vm238_vm2, %v1042_v57, %v1041_v59  ;;  %v1303_v6 = vld [vmem:[%s3832_s30 + $0x7] sm:$0x1]  ;;  %v1300_v7 = vld [vmem:[%s3832_s30 + $0x16] sm:$0x1] }
  0x28   : > { %v2365_v8 = vld [vmem:[%s3832_s30 + $0x3d] sm:$0x1]  ;;  %v2370_v9 = vrot.slane %v2363_v2, 7  ;;  %v2372_v11 = vrot.slane %v2364_v3, 6  ;;  %v2358_v12 = vld [vmem:[%s3832_s30 + $0xc] sm:$0x1]  ;;  %v1045_v22 = vsel %vm241_vm3, %v1044_v60, %v1043_v5 }
  0x29   : > { %3345 = vmatmul.mubr.msk.f32.vlgmr.msra.gmra.mrb[0].mxu0 %vm243_vm5, %v3875_v39  ;;  %v1311_v13 = vrot.slane %v1304_v61, 7  ;;  %v2374_v14 = vrot.slane %v2365_v8, 5  ;;  %v2359_v15 = vld [vmem:[%s3832_s30 + $0x1c] sm:$0x1]  ;;  %v2360_v16 = vld [vmem:[%s3832_s30 + $0x2c] sm:$0x1] }
  0x2a   : > { %3362 = vmatpush3.msk.msra.mxu0 %vm247_vm4, %v610_v41  ;;  %3363 = vmatprep.mubr.msk.f32.mxu0 %vm3738_vm0, %v3737_v0  ;;  %v2371_v17 = vsel %vm235_vm1, %v2370_v9, %v2362_v63  ;;  %v2361_v18 = vld [vmem:[%s3832_s30 + $0x3c] sm:$0x1]  ;;  %v2452_v19 = vrot.slane %v2359_v15, 7  ;;  %v2454_v20 = vrot.slane %v2360_v16, 6  ;;  %v2715_v21 = vld [vmem:[%s3832_s30 + $0xf] sm:$0x1] }
  0x2b   : > { %3366 = vmatprep.subr.mxu0 %v3737_v0  ;;  %v1306_v23 = vld [vmem:[%s3832_s30 + $0x37] sm:$0x1]  ;;  %v1313_v24 = vrot.slane %v1305_v62, 6  ;;  %v2373_v25 = vsel %vm238_vm2, %v2372_v11, %v2371_v17  ;;  %v2456_v26 = vrot.slane %v2361_v18, 5  ;;  %v2716_v27 = vld [vmem:[%s3832_s30 + $0x1f] sm:$0x1]  ;;  %v1312_v35 = vsel %vm235_vm1, %v1311_v13, %v1303_v6 }
  0x2c   : > { %v2717_v28 = vld [vmem:[%s3832_s30 + $0x2f] sm:$0x1]  ;;  %v3931_v29 = vsel %vm241_vm3, %v2374_v14, %v2373_v25  ;;  %v2453_v30 = vsel %vm235_vm1, %v2452_v19, %v2358_v12  ;;  %v2718_v31 = vld [vmem:[%s3832_s30 + $0x3f] sm:$0x1]  ;;  %v2723_v32 = vrot.slane %v2716_v27, 7  ;;  %v1393_v36 = vrot.slane %v1300_v7, 7 }
  0x2d   : > { %3364 = vmatmul.mubr.msk.f32.vlgmr.msra.gmra.mrb[2].mxu0 %vm243_vm5, %v3842_v10  ;;  %v2725_v33 = vrot.slane %v2717_v28, 6  ;;  %v2711_v34 = vld [vmem:[%s3832_s30 + $0xe] sm:$0x1]  ;;  %v2455_v37 = vsel %vm238_vm2, %v2454_v20, %v2453_v30  ;;  %v2727_v38 = vrot.slane %v2718_v31, 5  ;;  %v2712_v40 = vld [vmem:[%s3832_s30 + $0x1e] sm:$0x1]  ;;  %v1314_v54 = vsel %vm238_vm2, %v1313_v24, %v1312_v35 }
  0x2e   : > { %3367 = vmatpush3.msk.msra.mxu0 %vm247_vm4, %v692_v48  ;;  %3368 = vmatprep.mubr.msk.f32.mxu0 %vm3738_vm0, %v3737_v0  ;;  %v2713_v41 = vld [vmem:[%s3832_s30 + $0x2e] sm:$0x1]  ;;  %v1301_v42 = vld [vmem:[%s3832_s30 + $0x26] sm:$0x1]  ;;  %v3944_v43 = vsel %vm241_vm3, %v2456_v26, %v2455_v37  ;;  %v2724_v44 = vsel %vm235_vm1, %v2723_v32, %v2715_v21  ;;  %v2714_v45 = vld [vmem:[%s3832_s30 + $0x3e] sm:$0x1] }
  0x2f   : > { %3385 = vmatprep.subr.mxu0 %v3737_v0  ;;  %v2805_v46 = vrot.slane %v2712_v40, 7  ;;  %v2807_v47 = vrot.slane %v2713_v41, 6  ;;  %v1299_v48 = vld [vmem:[%s3832_s30 + $0x6] sm:$0x1]  ;;  %v2726_v49 = vsel %vm238_vm2, %v2725_v33, %v2724_v44  ;;  %v2809_v50 = vrot.slane %v2714_v45, 5 }
  0x30   : > { %v1315_v51 = vrot.slane %v1306_v23, 5  ;;  %v3955_v52 = vsel %vm241_vm3, %v2727_v38, %v2726_v49  ;;  %v1302_v55 = vld [vmem:[%s3832_s30 + $0x36] sm:$0x1]  ;;  %v1395_v56 = vrot.slane %v1301_v42, 6  ;;  %v1394_v58 = vsel %vm235_vm1, %v1393_v36, %v1299_v48  ;;  %v1657_v60 = vld [vmem:[%s3832_s30 + $0x19] sm:$0x1] }
  0x31   : > { %v2806_v53 = vsel %vm235_vm1, %v2805_v46, %v2711_v34  ;;  %v1397_v62 = vrot.slane %v1302_v55, 5  ;;  %v1658_v2 = vld [vmem:[%s3832_s30 + $0x29] sm:$0x1]  ;;  %v1664_v3 = vrot.slane %v1657_v60, 7  ;;  %v1653_v5 = vld [vmem:[%s3832_s30 + $0x18] sm:$0x1] }
  0x32   : > { %v2808_v57 = vsel %vm238_vm2, %v2807_v47, %v2806_v53  ;;  %v1316_v61 = vsel %vm241_vm3, %v1315_v51, %v1314_v54  ;;  %v1396_v63 = vsel %vm238_vm2, %v1395_v56, %v1394_v58  ;;  %v1659_v7 = vld [vmem:[%s3832_s30 + $0x39] sm:$0x1]  ;;  %v1666_v8 = vrot.slane %v1658_v2, 6  ;;  %v1654_v11 = vld [vmem:[%s3832_s30 + $0x28] sm:$0x1] }
  0x33   : > { %v3963_v59 = vsel %vm241_vm3, %v2809_v50, %v2808_v57  ;;  %v1398_v6 = vsel %vm241_vm3, %v1397_v62, %v1396_v63  ;;  %v1746_v12 = vrot.slane %v1653_v5, 7  ;;  %v1652_v13 = vld [vmem:[%s3832_s30 + $0x8] sm:$0x1]  ;;  %v1668_v14 = vrot.slane %v1659_v7, 5  ;;  %v1655_v16 = vld [vmem:[%s3832_s30 + $0x38] sm:$0x1] }
  0x34   : > { %v1748_v17 = vrot.slane %v1654_v11, 6  ;;  %v2010_v19 = vld [vmem:[%s3832_s30 + $0x1b] sm:$0x1]  ;;  %v1750_v21 = vrot.slane %v1655_v16, 5  ;;  %v2011_v23 = vld [vmem:[%s3832_s30 + $0x2b] sm:$0x1] }
  0x35   : > { %3369 = vmatmul.mubr.msk.f32.vlgmr.msra.gmra.mrb[2].mxu0 %vm243_vm5, %v3875_v39  ;;  %v1747_v18 = vsel %vm235_vm1, %v1746_v12, %v1652_v13  ;;  %v2017_v24 = vrot.slane %v2010_v19, 7  ;;  %v2009_v25 = vld [vmem:[%s3832_s30 + $0xb] sm:$0x1]  ;;  %v2006_v26 = vld [vmem:[%s3832_s30 + $0x1a] sm:$0x1]  ;;  %v2019_v30 = vrot.slane %v2011_v23, 6 }
  0x36   : > { %3386 = vmatpush3.msk.msra.mxu0 %vm247_vm4, %v963_v4  ;;  %3387 = vmatprep.mubr.msk.f32.mxu0 %vm3738_vm0, %v3737_v0  ;;  %v1656_v4 = vld [vmem:[%s3832_s30 + $0x9] sm:$0x1]  ;;  %v2012_v28 = vld [vmem:[%s3832_s30 + $0x3b] sm:$0x1]  ;;  %v2007_v32 = vld [vmem:[%s3832_s30 + $0x2a] sm:$0x1] }
  0x37   : > { %3390 = vmatprep.subr.mxu0 %v3737_v0  ;;  %v1665_v9 = vsel %vm235_vm1, %v1664_v3, %v1656_v4  ;;  %v2018_v31 = vsel %vm235_vm1, %v2017_v24, %v2009_v25  ;;  %v2099_v33 = vrot.slane %v2006_v26, 7  ;;  %v2005_v34 = vld [vmem:[%s3832_s30 + $0xa] sm:$0x1]  ;;  %v2021_v35 = vrot.slane %v2012_v28, 5  ;;  %v2008_v37 = vld [vmem:[%s3832_s30 + $0x3a] sm:$0x1] }
  0x38   : > { %v1667_v15 = vsel %vm238_vm2, %v1666_v8, %v1665_v9  ;;  %v2020_v36 = vsel %vm238_vm2, %v2019_v30, %v2018_v31  ;;  %v2101_v38 = vrot.slane %v2007_v32, 6  ;;  %v2103_v42 = vrot.slane %v2008_v37, 5  ;;  %s3661_s30 = sshll.u32 %s3743_s29, 4  ;;  %s3662_s30 = int_to_ptr.vmem [resolvable:$false] %s3661_s30 }
  0x39   : > { %3388 = vmatmul.mubr.msk.f32.vlgmr.msra.gmra.mrb[4].mxu0 %vm243_vm5, %v3842_v10  ;;  %v1669_v20 = vsel %vm241_vm3, %v1668_v14, %v1667_v15  ;;  %v2100_v40 = vsel %vm235_vm1, %v2099_v33, %v2005_v34  ;;  %v2022_v41 = vsel %vm241_vm3, %v2021_v35, %v2020_v36  ;;  %v3741_v53 = vmov 0   ;;  %s3663_s4 = scalar_lea.vmem %s3662_s30, 1024  ;;  %p3664_p1 = scmp.lt.s32.totalorder %s4293_s21, %s3662_s30 }
  0x3a   : > { %3391 = vmatpush3.msk.msra.mxu0 %vm247_vm4, %v1045_v22  ;;  %3392 = vmatprep.mubr.msk.f32.mxu0 %vm3738_vm0, %v3737_v0  ;;  %v1749_v22 = vsel %vm238_vm2, %v1748_v17, %v1747_v18  ;;  %v2102_v44 = vsel %vm238_vm2, %v2101_v38, %v2100_v40  ;;  %v3742_v16 = vmov 1966171168   ;;  %p3665_p2 = scmp.lt.s32.totalorder %s3663_s4, %s3657_s28 }
  0x3b   : > { %3409 = vmatprep.subr.mxu0 %v3737_v0  ;;  %v1751_v27 = vsel %vm241_vm3, %v1750_v21, %v1749_v22  ;;  %v2104_v45 = vsel %vm241_vm3, %v2103_v42, %v2102_v44  ;;  %3656 = vset.pattern.permute.xlu0 %v3741_v53  ;;  %v561_v17 = vunpack.c.l.s4 %v3742_v16 }
  0x3c   : > { %p3666_p3 = por %p3665_p2, %p3664_p1 }
  0x3d   : > { %v562_v19 = vunpack.c.0.s8 %v561_v17 }
  0x3e   : > { %p3667_p5 = pnand %p3666_p3, %p3660_p0 }
  0x41   : > { %3393 = vmatmul.mubr.msk.f32.vlgmr.msra.gmra.mrb[4].mxu0 %vm243_vm5, %v3875_v39 }
  0x42   : > { %3410 = vmatpush3.msk.msra.mxu0 %vm247_vm4, %v1316_v61  ;;  %3411 = vmatprep.mubr.msk.f32.mxu0 %vm3738_vm0, %v3737_v0 }
  0x43   : > { %3414 = vmatprep.subr.mxu0 %v3737_v0 }
  0x45   : > { %3412 = vmatmul.mubr.msk.f32.vlgmr.msra.gmra.mrb[6].mxu0 %vm243_vm5, %v3842_v10 }
  0x46   : > { %3415 = vmatpush3.msk.msra.mxu0 %vm247_vm4, %v1398_v6  ;;  %3416 = vmatprep.mubr.msk.f32.mxu0 %vm3738_vm0, %v3737_v0 }
  0x47   : > { %3433 = vmatprep.subr.mxu0 %v3737_v0 }
  0x4d   : > { %3417 = vmatmul.mubr.msk.f32.vlgmr.msra.gmra.mrb[6].mxu0 %vm243_vm5, %v3875_v39 }
  0x4e   : > { %3434 = vmatpush3.msk.msra.mxu0 %vm247_vm4, %v1669_v20  ;;  %3435 = vmatprep.mubr.msk.f32.mxu0 %vm3738_vm0, %v3737_v0 }
  0x4f   : > { %3438 = vmatprep.subr.mxu0 %v3737_v0 }
  0x51   : > { %3436 = vmatmul.mubr.msk.f32.vlgmr.msra.gmra.mrb[8].mxu0 %vm243_vm5, %v3842_v10 }
  0x52   : > { %3439 = vmatpush3.msk.msra.mxu0 %vm247_vm4, %v1751_v27  ;;  %3440 = vmatprep.mubr.msk.f32.mxu0 %vm3738_vm0, %v3737_v0 }
  0x53   : > { %3457 = vmatprep.subr.mxu0 %v3737_v0 }
  0x59   : > { %3441 = vmatmul.mubr.msk.f32.vlgmr.msra.gmra.mrb[8].mxu0 %vm243_vm5, %v3875_v39 }
  0x5a   : > { %3458 = vmatpush3.msk.msra.mxu0 %vm247_vm4, %v2022_v41  ;;  %3459 = vmatprep.mubr.msk.f32.mxu0 %vm3738_vm0, %v3737_v0 }
  0x5b   : > { %3462 = vmatprep.subr.mxu0 %v3737_v0 }
  0x5d   : > { %3460 = vmatmul.mubr.msk.f32.vlgmr.msra.gmra.mrb[10].mxu0 %vm243_vm5, %v3842_v10 }
  0x5e   : > { %3463 = vmatpush3.msk.msra.mxu0 %vm247_vm4, %v2104_v45  ;;  %3464 = vmatprep.mubr.msk.f32.mxu0 %vm3738_vm0, %v3737_v0 }
  0x5f   : > { %3481 = vmatprep.subr.mxu0 %v3737_v0 }
  0x65   : > { %3465 = vmatmul.mubr.msk.f32.vlgmr.msra.gmra.mrb[10].mxu0 %vm243_vm5, %v3875_v39 }
  0x66   : > { %3482 = vmatpush3.msk.msra.mxu0 %vm247_vm4, %v3931_v29  ;;  %3483 = vmatprep.mubr.msk.f32.mxu0 %vm3738_vm0, %v3737_v0  ;;  %v199_v29 = vlaneseq }
  0x67   : > { %3486 = vmatprep.subr.mxu0 %v3737_v0 }
  0x68   : > { %v203_v46 = vand.u32 127, %v199_v29 }
  0x69   : > { %3484 = vmatmul.mubr.msk.f32.vlgmr.msra.gmra.mrb[12].mxu0 %vm243_vm5, %v3842_v10 }
  0x6a   : > { %3487 = vmatpush3.msk.msra.mxu0 %vm247_vm4, %v3944_v43  ;;  %3488 = vmatprep.mubr.msk.f32.mxu0 %vm3738_vm0, %v3737_v0  ;;  %v4059_v43 = vshrl.u32 %v199_v29, 7  ;;  %v204_v47 = vmul.u32 2, %v203_v46 }
  0x6b   : > { %3505 = vmatprep.subr.mxu0 %v3737_v0 }
  0x6c   : > { %v201_v48 = vadd.s32 8, %v4059_v43  ;;  %v211_v49 = vadd.s32 1, %v204_v47  ;;  %vm205_vm9 = vcmp.eq.s32.totalorder %v4059_v43, %v204_v47  ;;  %v4190_v24 = vsub.s32 %v562_v19, %v4059_v43 }
  0x6e   : > { %vm212_vm6 = vcmp.eq.s32.totalorder %v4059_v43, %v211_v49  ;;  %vm213_vm7 = vcmp.eq.s32.totalorder %v201_v48, %v211_v49  ;;  %vm206_vm10 = vcmp.eq.s32.totalorder %v201_v48, %v204_v47 }
  0x6f   : > { %vm4063_vm8 = vmpackc.low %vm213_vm7, %vm212_vm6 }
  0x70   : > { %vm4074_vm11 = vmpackc.low %vm206_vm10, %vm205_vm9 }
  0x71   : > { %3489 = vmatmul.mubr.msk.f32.vlgmr.msra.gmra.mrb[12].mxu0 %vm243_vm5, %v3875_v39 }
  0x72   : > { %3506 = vmatpush3.msk.msra.mxu0 %vm247_vm4, %v3955_v52  ;;  %3507 = vmatprep.mubr.msk.f32.mxu0 %vm3738_vm0, %v3737_v0  ;;  %v221_v52 = vld [vmem:[%s4351_s2] sm:$0xf] }
  0x73   : > { %3510 = vmatprep.subr.mxu0 %v3737_v0  ;;  %554 = vperm.xlu0 %3656, %v221_v52  }
  0x75   : > { %3508 = vmatmul.mubr.msk.f32.vlgmr.msra.gmra.mrb[14].mxu0 %vm243_vm5, %v3842_v10  ;;  %v3740_v10 = vmov 1.0|1.0  }
  0x76   : > { %3511 = vmatpush3.msk.msra.mxu0 %vm247_vm4, %v3963_v59  ;;  %3512 = vmatprep.mubr.msk.f32.mxu0 %vm3738_vm0, %v3737_v0 }
  0x77   : > { %3531 = vmatpush3.bf16.msk.msra.mxu1 %vm4063_vm8, %v3740_v10 }
  0x78   : > { %3532 = vmatprep.subr.bf16.mxu1 %v3739_v1 }
  0x7d   : > { %3513 = vmatmul.mubr.msk.f32.vlgmr.msra.gmra.mrb[14].mxu0 %vm243_vm5, %v3875_v39 }
  0xf2   : > { %v4186_v21 = vpop.permute.xlu0 %554 }
  0xfc   : > { %v401_v54 = vpop.f32.mrb[0].mxu0 }
  0xfd   : > { %v406_v55 = vrot.slane %v401_v54, 4  ;;  %v3346_v39 = vpop.f32.mrb[1].mxu0 }
  0xff   : > { %3352 = vmatmul.mubr.msk.f32.vlgmr.msra.gmra.mrb[0].mxu1 %vm407_vm12, %v406_v55 }
 0x100   : > { %3534 = vmatpush3.bf16.msk.msra.mxu1 %vm4074_vm11, %v3740_v10  ;;  %3358 = vmatprep.mubr.msk.f32.mxu1 %vm3738_vm0, %v3737_v0 }
 0x101   : > { %3535 = vmatprep.subr.bf16.mxu1 %v3739_v1 }
 0x103   : > { %3359 = vmatmul.mubr.msk.f32.vlgmr.msra.gmra.mrb[2].mxu1 %vm407_vm12, %v401_v54 }
 0x104   : > { %3537 = vmatpush3.bf16.msk.msra.mxu1 %vm4063_vm8, %v3740_v10  ;;  %3375 = vmatprep.mubr.msk.f32.mxu1 %vm3738_vm0, %v3737_v0 }
 0x105   : > { %3538 = vmatprep.subr.bf16.mxu1 %v3739_v1 }
 0x108   : > { %v761_v56 = vpop.f32.mrb[2].mxu0 }
 0x109   : > { %v766_v57 = vrot.slane %v761_v56, 4  ;;  %v3370_v58 = vpop.f32.mrb[3].mxu0 }
 0x10b   : > { %3376 = vmatmul.mubr.msk.f32.vlgmr.msra.gmra.mrb[4].mxu1 %vm407_vm12, %v766_v57 }
 0x10c   : > { %3540 = vmatpush3.bf16.msk.msra.mxu1 %vm4074_vm11, %v3740_v10  ;;  %3382 = vmatprep.mubr.msk.f32.mxu1 %vm3738_vm0, %v3737_v0 }
 0x10d   : > { %3541 = vmatprep.subr.bf16.mxu1 %v3739_v1 }
 0x10f   : > { %3383 = vmatmul.mubr.msk.f32.vlgmr.msra.gmra.mrb[6].mxu1 %vm407_vm12, %v761_v56 }
 0x110   : > { %3543 = vmatpush3.bf16.msk.msra.mxu1 %vm4063_vm8, %v3740_v10  ;;  %3399 = vmatprep.mubr.msk.f32.mxu1 %vm3738_vm0, %v3737_v0 }
 0x111   : > { %3544 = vmatprep.subr.bf16.mxu1 %v3739_v1 }
 0x114   : > { %v1114_v59 = vpop.f32.mrb[4].mxu0 }
 0x115   : > { %v1119_v60 = vrot.slane %v1114_v59, 4  ;;  %v3394_v61 = vpop.f32.mrb[5].mxu0 }
 0x117   : > { %3400 = vmatmul.mubr.msk.f32.vlgmr.msra.gmra.mrb[8].mxu1 %vm407_vm12, %v1119_v60 }
 0x118   : > { %3546 = vmatpush3.bf16.msk.msra.mxu1 %vm4074_vm11, %v3740_v10  ;;  %3406 = vmatprep.mubr.msk.f32.mxu1 %vm3738_vm0, %v3737_v0 }
 0x119   : > { %3547 = vmatprep.subr.bf16.mxu1 %v3739_v1 }
 0x11b   : > { %3407 = vmatmul.mubr.msk.f32.vlgmr.msra.gmra.mrb[10].mxu1 %vm407_vm12, %v1114_v59 }
 0x11c   : > { %3549 = vmatpush3.bf16.msk.msra.mxu1 %vm4063_vm8, %v3740_v10  ;;  %3423 = vmatprep.mubr.msk.f32.mxu1 %vm3738_vm0, %v3737_v0 }
 0x11d   : > { %3550 = vmatprep.subr.bf16.mxu1 %v3739_v1 }
 0x120   : > { %v1467_v62 = vpop.f32.mrb[6].mxu0 }
 0x121   : > { %v1472_v63 = vrot.slane %v1467_v62, 4  ;;  %v3418_v2 = vpop.f32.mrb[7].mxu0 }
 0x123   : > { %3424 = vmatmul.mubr.msk.f32.vlgmr.msra.gmra.mrb[12].mxu1 %vm407_vm12, %v1472_v63 }
 0x124   : > { %3552 = vmatpush3.bf16.msk.msra.mxu1 %vm4074_vm11, %v3740_v10  ;;  %3430 = vmatprep.mubr.msk.f32.mxu1 %vm3738_vm0, %v3737_v0 }
 0x125   : > { %3553 = vmatprep.subr.bf16.mxu1 %v3739_v1 }
 0x127   : > { %3431 = vmatmul.mubr.msk.f32.vlgmr.msra.gmra.mrb[14].mxu1 %vm407_vm12, %v1467_v62 }
 0x128   : > { %3555 = vmatpush3.bf16.msk.msra.mxu1 %vm4063_vm8, %v3740_v10  ;;  %3447 = vmatprep.mubr.msk.f32.mxu1 %vm3738_vm0, %v3737_v0 }
 0x129   : > { %3556 = vmatprep.subr.bf16.mxu1 %v3739_v1 }
 0x12c   : > { %v1820_v3 = vpop.f32.mrb[8].mxu0 }
 0x12d   : > { %v1825_v4 = vrot.slane %v1820_v3, 4  ;;  %v3442_v5 = vpop.f32.mrb[9].mxu0 }
 0x12f   : > { %3448 = vmatmul.mubr.msk.f32.vlgmr.msra.gmra.mrb[16].mxu1 %vm407_vm12, %v1825_v4 }
 0x130   : > { %3558 = vmatpush3.bf16.msk.msra.mxu1 %vm4074_vm11, %v3740_v10  ;;  %3454 = vmatprep.mubr.msk.f32.mxu1 %vm3738_vm0, %v3737_v0 }
 0x131   : > { %3559 = vmatprep.subr.bf16.mxu1 %v3739_v1 }
 0x133   : > { %3455 = vmatmul.mubr.msk.f32.vlgmr.msra.gmra.mrb[18].mxu1 %vm407_vm12, %v1820_v3 }
 0x134   : > { %3561 = vmatpush3.bf16.msk.msra.mxu1 %vm4063_vm8, %v3740_v10  ;;  %3471 = vmatprep.mubr.msk.f32.mxu1 %vm3738_vm0, %v3737_v0 }
 0x135   : > { %3562 = vmatprep.subr.bf16.mxu1 %v3739_v1 }
 0x138   : > { %v2173_v6 = vpop.f32.mrb[10].mxu0 }
 0x139   : > { %v2178_v7 = vrot.slane %v2173_v6, 4  ;;  %v3466_v8 = vpop.f32.mrb[11].mxu0 }
 0x13b   : > { %3472 = vmatmul.mubr.msk.f32.vlgmr.msra.gmra.mrb[20].mxu1 %vm407_vm12, %v2178_v7 }
 0x13c   : > { %3564 = vmatpush3.bf16.msk.msra.mxu1 %vm4074_vm11, %v3740_v10  ;;  %3478 = vmatprep.mubr.msk.f32.mxu1 %vm3738_vm0, %v3737_v0 }
 0x13d   : > { %3565 = vmatprep.subr.bf16.mxu1 %v3739_v1 }
 0x13f   : > { %3479 = vmatmul.mubr.msk.f32.vlgmr.msra.gmra.mrb[22].mxu1 %vm407_vm12, %v2173_v6 }
 0x140   : > { %3567 = vmatpush3.bf16.msk.msra.mxu1 %vm4063_vm8, %v3740_v10  ;;  %3495 = vmatprep.mubr.msk.f32.mxu1 %vm3738_vm0, %v3737_v0 }
 0x141   : > { %3568 = vmatprep.subr.bf16.mxu1 %v3739_v1 }
 0x144   : > { %v2526_v9 = vpop.f32.mrb[12].mxu0 }
 0x145   : > { %v2531_v11 = vrot.slane %v2526_v9, 4  ;;  %v3490_v12 = vpop.f32.mrb[13].mxu0 }
 0x147   : > { %3496 = vmatmul.mubr.msk.f32.vlgmr.msra.gmra.mrb[24].mxu1 %vm407_vm12, %v2531_v11 }
 0x148   : > { %3570 = vmatpush3.bf16.msk.msra.mxu1 %vm4074_vm11, %v3740_v10  ;;  %3502 = vmatprep.mubr.msk.f32.mxu1 %vm3738_vm0, %v3737_v0 }
 0x149   : > { %3571 = vmatprep.subr.bf16.mxu1 %v3739_v1 }
 0x14b   : > { %3503 = vmatmul.mubr.msk.f32.vlgmr.msra.gmra.mrb[26].mxu1 %vm407_vm12, %v2526_v9 }
 0x14c   : > { %3573 = vmatpush3.bf16.msk.msra.mxu1 %vm4063_vm8, %v3740_v10  ;;  %3519 = vmatprep.mubr.msk.f32.mxu1 %vm3738_vm0, %v3737_v0 }
 0x14d   : > { %3574 = vmatprep.subr.bf16.mxu1 %v3739_v1 }
 0x150   : > { %v2879_v13 = vpop.f32.mrb[14].mxu0 }
 0x151   : > { %v2884_v14 = vrot.slane %v2879_v13, 4  ;;  %v3514_v15 = vpop.f32.mrb[15].mxu0 }
 0x153   : > { %3520 = vmatmul.mubr.msk.f32.vlgmr.msra.gmra.mrb[28].mxu1 %vm407_vm12, %v2884_v14 }
 0x154   : > { %3576 = vmatpush3.bf16.msk.msra.mxu1 %vm4074_vm11, %v3740_v10  ;;  %3526 = vmatprep.mubr.msk.f32.mxu1 %vm3738_vm0, %v3737_v0 }
 0x157   : > { %3527 = vmatmul.mubr.msk.f32.vlgmr.msra.gmra.mrb[30].mxu1 %vm407_vm12, %v2879_v13 }
 0x1d2   : > { %v476_v18 = vpop.f32.mrb[0].mxu1 }
 0x1d3   : > { %v3353_v1 = vpop.f32.mrb[1].mxu1 }
 0x1d6   : > { %v548_v20 = vpop.f32.mrb[2].mxu1 }
 0x1d7   : > { %v549_v22 = vadd.f32 %v548_v20, %v476_v18  ;;  %v3360_v23 = vpop.f32.mrb[3].mxu1 }
 0x1d9   : > { %v557_v25 = vadd.f32 %v4186_v21, %v549_v22 }
 0x1db   : > { %v558_v0 = vmax.f32 %v557_v25, 0.0 }
 0x1dd   : > { %v566_v26 = vrot.slane %v558_v0, %v4190_v24 }
 0x1de   : > { %v835_v27 = vpop.f32.mrb[4].mxu1 }
 0x1df   : > { %v567_v28 = vcombine.high %v566_v26, %v566_v26  ;;  %v574_v30 = vrot.slane %v566_v26, %v4190_v24  ;;  %v3377_v31 = vpop.f32.mrb[5].mxu1 }
 0x1e1   : > { %v581_v32 = vrot.slane %v567_v28, %v4190_v24  ;;  %v582_v33 = vcombine.high %v574_v30, %v574_v30  ;;  %589 = vst.msk [vmem:[%s4198_s18] sm:$0x1] %vm588_vm13, %v574_v30 }
 0x1e2   : > { %v907_v34 = vpop.f32.mrb[6].mxu1 }
 0x1e3   : > { %v583_v35 = vcombine.high %v581_v32, %v581_v32  ;;  %590 = vst.msk [vmem:[%s4198_s18 + $0x8] sm:$0x1] %vm588_vm13, %v581_v32  ;;  %591 = vst.msk [vmem:[%s4198_s18 + $0x10] sm:$0x1] %vm588_vm13, %v582_v33  ;;  %v908_v36 = vadd.f32 %v907_v34, %v835_v27  ;;  %v3384_v37 = vpop.f32.mrb[7].mxu1 }
 0x1e5   : > { %592 = vst.msk [vmem:[%s4198_s18 + $0x18] sm:$0x1] %vm588_vm13, %v583_v35  ;;  %v911_v38 = vadd.f32 %v908_v36, %v4186_v21 }
 0x1e7   : > { %v912_v40 = vmax.f32 %v911_v38, 0.0 }
 0x1e9   : > { %v920_v41 = vrot.slane %v912_v40, %v4190_v24 }
 0x1ea   : > { %v1188_v42 = vpop.f32.mrb[8].mxu1 }
 0x1eb   : > { %v921_v44 = vcombine.high %v920_v41, %v920_v41  ;;  %v928_v45 = vrot.slane %v920_v41, %v4190_v24  ;;  %v3401_v29 = vpop.f32.mrb[9].mxu1 }
 0x1ed   : > { %v935_v46 = vrot.slane %v921_v44, %v4190_v24  ;;  %v936_v43 = vcombine.high %v928_v45, %v928_v45  ;;  %942 = vst.msk [vmem:[%s4198_s18 + $0x1] sm:$0x1] %vm588_vm13, %v928_v45 }
 0x1ee   : > { %v1260_v47 = vpop.f32.mrb[10].mxu1 }
 0x1ef   : > { %v937_v48 = vcombine.high %v935_v46, %v935_v46  ;;  %943 = vst.msk [vmem:[%s4198_s18 + $0x9] sm:$0x1] %vm588_vm13, %v935_v46  ;;  %944 = vst.msk [vmem:[%s4198_s18 + $0x11] sm:$0x1] %vm588_vm13, %v936_v43  ;;  %v1261_v49 = vadd.f32 %v1260_v47, %v1188_v42  ;;  %v3408_v50 = vpop.f32.mrb[11].mxu1 }
 0x1f1   : > { %945 = vst.msk [vmem:[%s4198_s18 + $0x19] sm:$0x1] %vm588_vm13, %v937_v48  ;;  %v1264_v10 = vadd.f32 %v1261_v49, %v4186_v21 }
 0x1f3   : > { %v1265_v51 = vmax.f32 %v1264_v10, 0.0 }
 0x1f5   : > { %v1273_v52 = vrot.slane %v1265_v51, %v4190_v24 }
 0x1f6   : > { %v1541_v53 = vpop.f32.mrb[12].mxu1 }
 0x1f7   : > { %v1274_v54 = vcombine.high %v1273_v52, %v1273_v52  ;;  %v1281_v55 = vrot.slane %v1273_v52, %v4190_v24  ;;  %v3425_v39 = vpop.f32.mrb[13].mxu1 }
 0x1f9   : > { %v1288_v56 = vrot.slane %v1274_v54, %v4190_v24  ;;  %v1289_v57 = vcombine.high %v1281_v55, %v1281_v55  ;;  %1295 = vst.msk [vmem:[%s4198_s18 + $0x2] sm:$0x1] %vm588_vm13, %v1281_v55 }
 0x1fa   : > { %v1613_v58 = vpop.f32.mrb[14].mxu1 }
 0x1fb   : > { %v1290_v59 = vcombine.high %v1288_v56, %v1288_v56  ;;  %1296 = vst.msk [vmem:[%s4198_s18 + $0xa] sm:$0x1] %vm588_vm13, %v1288_v56  ;;  %1297 = vst.msk [vmem:[%s4198_s18 + $0x12] sm:$0x1] %vm588_vm13, %v1289_v57  ;;  %v1614_v60 = vadd.f32 %v1613_v58, %v1541_v53  ;;  %v3432_v61 = vpop.f32.mrb[15].mxu1 }
 0x1fd   : > { %1298 = vst.msk [vmem:[%s4198_s18 + $0x1a] sm:$0x1] %vm588_vm13, %v1290_v59  ;;  %v1617_v62 = vadd.f32 %v1614_v60, %v4186_v21 }
 0x1ff   : > { %v1618_v63 = vmax.f32 %v1617_v62, 0.0 }
 0x201   : > { %v1626_v2 = vrot.slane %v1618_v63, %v4190_v24 }
 0x202   : > { %v1894_v3 = vpop.f32.mrb[16].mxu1 }
 0x203   : > { %v1627_v4 = vcombine.high %v1626_v2, %v1626_v2  ;;  %v1634_v5 = vrot.slane %v1626_v2, %v4190_v24  ;;  %v3449_v6 = vpop.f32.mrb[17].mxu1 }
 0x205   : > { %v1641_v7 = vrot.slane %v1627_v4, %v4190_v24  ;;  %v1642_v8 = vcombine.high %v1634_v5, %v1634_v5  ;;  %1648 = vst.msk [vmem:[%s4198_s18 + $0x3] sm:$0x1] %vm588_vm13, %v1634_v5 }
 0x206   : > { %v1966_v9 = vpop.f32.mrb[18].mxu1 }
 0x207   : > { %v1643_v11 = vcombine.high %v1641_v7, %v1641_v7  ;;  %1649 = vst.msk [vmem:[%s4198_s18 + $0xb] sm:$0x1] %vm588_vm13, %v1641_v7  ;;  %1650 = vst.msk [vmem:[%s4198_s18 + $0x13] sm:$0x1] %vm588_vm13, %v1642_v8  ;;  %v1967_v12 = vadd.f32 %v1966_v9, %v1894_v3  ;;  %v3456_v13 = vpop.f32.mrb[19].mxu1 }
 0x209   : > { %1651 = vst.msk [vmem:[%s4198_s18 + $0x1b] sm:$0x1] %vm588_vm13, %v1643_v11  ;;  %v1970_v14 = vadd.f32 %v1967_v12, %v4186_v21 }
 0x20b   : > { %v1971_v15 = vmax.f32 %v1970_v14, 0.0 }
 0x20d   : > { %v1979_v16 = vrot.slane %v1971_v15, %v4190_v24 }
 0x20e   : > { %v2247_v17 = vpop.f32.mrb[20].mxu1 }
 0x20f   : > { %v1980_v18 = vcombine.high %v1979_v16, %v1979_v16  ;;  %v1987_v1 = vrot.slane %v1979_v16, %v4190_v24  ;;  %v3473_v19 = vpop.f32.mrb[21].mxu1 }
 0x211   : > { %v1994_v20 = vrot.slane %v1980_v18, %v4190_v24  ;;  %v1995_v22 = vcombine.high %v1987_v1, %v1987_v1  ;;  %2001 = vst.msk [vmem:[%s4198_s18 + $0x4] sm:$0x1] %vm588_vm13, %v1987_v1 }
 0x212   : > { %v2319_v23 = vpop.f32.mrb[22].mxu1 }
 0x213   : > { %v1996_v25 = vcombine.high %v1994_v20, %v1994_v20  ;;  %2002 = vst.msk [vmem:[%s4198_s18 + $0xc] sm:$0x1] %vm588_vm13, %v1994_v20  ;;  %2003 = vst.msk [vmem:[%s4198_s18 + $0x14] sm:$0x1] %vm588_vm13, %v1995_v22  ;;  %v2320_v0 = vadd.f32 %v2319_v23, %v2247_v17  ;;  %v3480_v26 = vpop.f32.mrb[23].mxu1 }
 0x215   : > { %2004 = vst.msk [vmem:[%s4198_s18 + $0x1c] sm:$0x1] %vm588_vm13, %v1996_v25  ;;  %v2323_v27 = vadd.f32 %v2320_v0, %v4186_v21 }
 0x217   : > { %v2324_v28 = vmax.f32 %v2323_v27, 0.0 }
 0x219   : > { %v2332_v30 = vrot.slane %v2324_v28, %v4190_v24 }
 0x21a   : > { %v2600_v31 = vpop.f32.mrb[24].mxu1 }
 0x21b   : > { %v2333_v32 = vcombine.high %v2332_v30, %v2332_v30  ;;  %v2340_v33 = vrot.slane %v2332_v30, %v4190_v24  ;;  %v3497_v34 = vpop.f32.mrb[25].mxu1 }
 0x21d   : > { %v2347_v35 = vrot.slane %v2333_v32, %v4190_v24  ;;  %v2348_v36 = vcombine.high %v2340_v33, %v2340_v33  ;;  %2354 = vst.msk [vmem:[%s4198_s18 + $0x5] sm:$0x1] %vm588_vm13, %v2340_v33 }
 0x21e   : > { %v2672_v37 = vpop.f32.mrb[26].mxu1 }
 0x21f   : > { %v2349_v38 = vcombine.high %v2347_v35, %v2347_v35  ;;  %2355 = vst.msk [vmem:[%s4198_s18 + $0xd] sm:$0x1] %vm588_vm13, %v2347_v35  ;;  %2356 = vst.msk [vmem:[%s4198_s18 + $0x15] sm:$0x1] %vm588_vm13, %v2348_v36  ;;  %v2673_v40 = vadd.f32 %v2672_v37, %v2600_v31  ;;  %v3504_v41 = vpop.f32.mrb[27].mxu1 }
 0x221   : > { %2357 = vst.msk [vmem:[%s4198_s18 + $0x1d] sm:$0x1] %vm588_vm13, %v2349_v38  ;;  %v2676_v42 = vadd.f32 %v2673_v40, %v4186_v21 }
 0x223   : > { %v2677_v44 = vmax.f32 %v2676_v42, 0.0 }
 0x225   : > { %v2685_v45 = vrot.slane %v2677_v44, %v4190_v24 }
 0x226   : > { %v2953_v29 = vpop.f32.mrb[28].mxu1 }
 0x227   : > { %v2686_v46 = vcombine.high %v2685_v45, %v2685_v45  ;;  %v2693_v43 = vrot.slane %v2685_v45, %v4190_v24  ;;  %v3521_v47 = vpop.f32.mrb[29].mxu1 }
 0x229   : > { %v2700_v48 = vrot.slane %v2686_v46, %v4190_v24  ;;  %v2701_v49 = vcombine.high %v2693_v43, %v2693_v43  ;;  %2707 = vst.msk [vmem:[%s4198_s18 + $0x6] sm:$0x1] %vm588_vm13, %v2693_v43 }
 0x22a   : > { %v3025_v50 = vpop.f32.mrb[30].mxu1 }
 0x22b   : > { %v2702_v10 = vcombine.high %v2700_v48, %v2700_v48  ;;  %2708 = vst.msk [vmem:[%s4198_s18 + $0xe] sm:$0x1] %vm588_vm13, %v2700_v48  ;;  %2709 = vst.msk [vmem:[%s4198_s18 + $0x16] sm:$0x1] %vm588_vm13, %v2701_v49  ;;  %v3026_v51 = vadd.f32 %v3025_v50, %v2953_v29  ;;  %v3528_v52 = vpop.f32.mrb[31].mxu1 }
 0x22d   : > { %2710 = vst.msk [vmem:[%s4198_s18 + $0x1e] sm:$0x1] %vm588_vm13, %v2702_v10  ;;  %v3029_v53 = vadd.f32 %v3026_v51, %v4186_v21 }
 0x22f   : > { %v3030_v54 = vmax.f32 %v3029_v53, 0.0 }
 0x231   : > { %v3038_v55 = vrot.slane %v3030_v54, %v4190_v24 }
 0x233   : > { %v3039_v39 = vcombine.high %v3038_v55, %v3038_v55  ;;  %v3046_v56 = vrot.slane %v3038_v55, %v4190_v24 }
 0x235   : > { %v3053_v57 = vrot.slane %v3039_v39, %v4190_v24  ;;  %v3054_v58 = vcombine.high %v3046_v56, %v3046_v56  ;;  %3060 = vst.msk [vmem:[%s4198_s18 + $0x7] sm:$0x1] %vm588_vm13, %v3046_v56 }
 0x237   : > { %v3055_v21 = vcombine.high %v3053_v57, %v3053_v57  ;;  %3061 = vst.msk [vmem:[%s4198_s18 + $0xf] sm:$0x1] %vm588_vm13, %v3053_v57  ;;  %3062 = vst.msk [vmem:[%s4198_s18 + $0x17] sm:$0x1] %vm588_vm13, %v3054_v58 }
 0x239   : > { %3063 = vst.msk [vmem:[%s4198_s18 + $0x1f] sm:$0x1] %vm588_vm13, %v3055_v21 }
 0x23a   : > { %3670 = shalt.err (!%p3667_p5)
}
 0x23b   : > { %s3671_s5 = scalar_lea.hbm %s4291_s27, 512  ;;  %s3675_s8 = scalar_lea.hbm %s4352_s3, 1024 }
 0x23c   : > { %p3672_p6 = scmp.ne.s32.totalorder %s4291_s27, %s3671_s5  ;;  %p3676_p10 = scmp.lt.u32.totalorder %s4291_s27, %s4352_s3 }
 0x23d   : > { %p3677_p11 = scmp.lt.u32.totalorder %s3675_s8, %s3671_s5  ;;  %p3679_p13 = scmp.lt.u32.totalorder %s3671_s5, %s4291_s27 }
 0x23e   : > { %p3673_p7 = pnand %p3672_p6, %p3806_p4 }
 0x23f   : > { %p3678_p12 = por %p3677_p11, %p3676_p10 }
 0x240   : > { %p3674_p9 = pneg %p3673_p7 }
 0x241   : > { %p3680_p0 = por %p3679_p13, %p3678_p12 }
 0x243   : > { %p3681_p1 = pnand %p3680_p0, %p3674_p9 }
 0x245   : > { %3684 = shalt.err (!%p3681_p1)
}
 0x246   : > { %s3744_s11 = smov 128   ;;  %s3745_s18 = smov 8  }
 0x247   : > { %3593 = dma.vmem_to_hbm [thread:$0]  (%p3806_p4), %s4293_s21, 512, %s4291_s27, %s4303_s15, %s3744_s11, %s3744_s11, %s3745_s18  }
 0x248 PF: > { %p3599_p2 = scmp.ge.s32.totalorder %s3735_s17, 2  ;;  %s3094_s19 = sand.u32 1, %s3715_s12  }
 0x249   : > { %s3095_s23 = scalar_lea.sflag [#allocation3], %s3094_s19 }
 0x24a   : > { %p3596_p3 = pnand %p3599_p2, %p3813_p8 }
 0x24c   : > { %3710 = dma.done.wait (!%p3596_p3), %s3095_s23, 512  }
 0x24d   : > { %3712 = vsyncadd (!%p3596_p3), %s3095_s23, 4294966784  ;;  %s16_s17 = sadd.s32 1, %s3735_s17   ;;  %s4359_s12 = smov %s3719_s13 }
 0x24e   : > { %p13_p5 = scmp.ge.s32.totalorder %s16_s17, 4   ;;  %s4360_s13 = smov %s3723_s14 }
 0x24f   : > { %s4361_s14 = smov %s3819_s25  ;;  %s4362_s15 = smov %s3731_s16 }
 0x250   : > { %s4363_s16 = smov %s4365_s20  ;;  %15 = sbr.rel (!%p13_p5) target bundleno = 4 (0x4), region = 68 }
 0x257   :  { %3100 = vsyncpa [#allocation3], 1 }
 0x258   :  { %3102 = vsyncpa [#allocation3 + $0x1], 1 }

</bundles_post_ra>
